<compile_context>
chip_gen: v7x
topology: tpu7x:2x2x1
jax: 0.10.0
libtpu: 0.0.40
codegen_flags: <defaults>
</compile_context>

<pallas_src>
import functools

import jax
import jax.numpy as jnp
from jax import lax
from jax.experimental import pallas as pl
from jax.experimental.pallas import tpu as pltpu


def _swish(v):
    return v * jax.nn.sigmoid(v)


def residual_block_kernel(x_ref, temb_ref,
                          g1_ref, be1_ref, mg1_ref, mgT1_ref, cw1_ref, b1_ref,
                          g2_ref, be2_ref, mg2_ref, mgT2_ref, cw2_ref, b2_ref,
                          wsd_ref, bs_ref,
                          o_ref,
                          pad1_ref, pad2_ref,
                          *, H, W, Cin, Cout, nb, use_time, identity_shortcut,
                          mm_dtype):
    f32 = jnp.float32
    WCi, WCo = W * Cin, W * Cout
    M = nb * H                                    # matmul M dim for the block

    def group_norm(v3, mg_ref, mgT_ref, g_ref, b_ref):
        # v3: (nb, H, W*C) f32.  mg is pre-scaled by 1/(H*W*Cg); two-pass var.
        mean_g = jnp.dot(jnp.sum(v3, axis=1), mg_ref[...],
                         preferred_element_type=f32)              # (nb, G)
        mean_c = jnp.dot(mean_g, mgT_ref[...],
                         preferred_element_type=f32)              # (nb, W*C)
        cen = v3 - mean_c[:, None, :]
        var_g = jnp.dot(jnp.sum(cen * cen, axis=1), mg_ref[...],
                        preferred_element_type=f32)               # (nb, G)
        inv_c = jnp.dot(lax.rsqrt(var_g + 1e-5), mgT_ref[...],
                        preferred_element_type=f32)               # (nb, W*C)
        return cen * inv_c[:, None, :] * g_ref[...] + b_ref[...]

    def conv3x3(a3, pad_ref, cw_ref, b_ref, wc_in, wc_out):
        # 3x3 "same" conv on lane-dense activations, batched over nb samples.
        # Stage into a per-sample vertically padded f32 scratch, then 3 fat
        # MXU matmuls (one per kernel row dy) with M = nb*H.  Horizontal
        # padding is folded into the banded weights cw[dy].
        pad_ref[:, pl.ds(0, 1), :] = jnp.zeros((nb, 1, wc_in), pad_ref.dtype)
        pad_ref[:, pl.ds(H + 1, 1), :] = jnp.zeros((nb, 1, wc_in), pad_ref.dtype)
        pad_ref[:, pl.ds(1, H), :] = a3
        acc = jnp.zeros((M, wc_out), f32)
        for dy in range(3):                       # static, 3 taps
            op = pad_ref[:, pl.ds(dy, H), :].reshape(M, wc_in).astype(mm_dtype)
            acc = acc + jnp.dot(op, cw_ref[dy], preferred_element_type=f32)
        return acc + b_ref[...]

    x2 = x_ref[...].astype(f32)                   # (nb*H, W*Cin)
    x3 = x2.reshape(nb, H, WCi)

    # h = conv1(act1(norm1(x)))
    a1 = _swish(group_norm(x3, mg1_ref, mgT1_ref, g1_ref, be1_ref))
    h = conv3x3(a1, pad1_ref, cw1_ref, b1_ref, WCi, WCo)          # (nb*H, W*Cout)
    h3 = h.reshape(nb, H, WCo)

    # h += time_emb(time_act(t))[:, :, None, None]  (projection hoisted out)
    if use_time:
        h3 = h3 + temb_ref[...]                   # (nb, 1, W*Cout) broadcast

    # h = conv2(dropout(act2(norm2(h))))
    # TODO(synk): nn.Dropout(0.1) training-mode stochastic masking not
    # implemented; eval-mode (identity) semantics are used here.
    a2 = _swish(group_norm(h3, mg2_ref, mgT2_ref, g2_ref, be2_ref))
    h2 = conv3x3(a2, pad2_ref, cw2_ref, b2_ref, WCo, WCo)         # (nb*H, W*Cout)

    # out = h + shortcut(x): identity when Cin == Cout, else 1x1 conv as a
    # block-diagonal lane-dense matmul.
    if identity_shortcut:
        sc = x2
    else:
        sc = jnp.dot(x2.astype(mm_dtype), wsd_ref[...],
                     preferred_element_type=f32) + bs_ref[...]
    o_ref[...] = (h2 + sc).astype(o_ref.dtype)


def _pick_samples_per_block(N):
    # Generation-aware grid sizing: v7x has 2 TensorCores -> want >= 4 grid
    # steps so each core still has >= 2 steps of pipeline depth; single-TC
    # v5e/v6e want fewer, fatter steps but >= 2 for DMA/compute overlap.
    min_steps = 2
    try:
        kind = jax.devices()[0].device_kind.lower()
        if "v7" in kind or "7x" in kind:
            min_steps = 4
    except Exception:
        pass
    for cand in range(N, 0, -1):
        if N % cand == 0 and (N // cand) >= min_steps:
            return cand
    return 1


def residual_block_forward(x_nchw, t, params, *, n_groups,
                           matmul_dtype=jnp.bfloat16, io_dtype=None,
                           samples_per_block=None):
    N, Cin, H, W = x_nchw.shape
    Cout = params["w1"].shape[-1]
    G = n_groups
    assert Cin % G == 0 and Cout % G == 0, "n_groups must divide channel counts"
    assert H % 8 == 0, "H must be a multiple of 8 (sublane-aligned batched tiles)"
    use_time = t is not None
    identity_shortcut = (Cin == Cout)
    f32 = jnp.float32
    if io_dtype is None:
        io_dtype = matmul_dtype        # bf16 activation I/O on the bf16 path
    WCi, WCo = W * Cin, W * Cout

    nb = samples_per_block or _pick_samples_per_block(N)
    assert N % nb == 0
    grid = (N // nb,)

    # ---- wrapper-side constants (DMA'd once; constant index maps) -----------
    def band_weights(w9, Ci, Co):
        # (9, Ci, Co) HWIO taps -> (3, W*Ci, W*Co) banded matrices; horizontal
        # "same" padding realised by clipping the band at the w edges.
        w4 = w9.reshape(3, 3, Ci, Co).astype(f32)
        dx = jnp.arange(3)[:, None, None]
        wo = jnp.arange(W)[None, :, None]
        wp = jnp.arange(W)[None, None, :]
        band = (wp == wo + dx - 1).astype(f32)                # (3, W, W)
        m = jnp.einsum("xwp,yxio->ypiwo", band, w4)           # (3, Wp, Ci, W, Co)
        return m.reshape(3, W * Ci, W * Co).astype(matmul_dtype)

    def gn_masks(C):
        cg = C // G
        ch = jnp.arange(W * C) % C
        memb = (ch[:, None] // cg == jnp.arange(G)[None, :]).astype(f32)
        return memb / float(H * W * cg), memb.T

    def tile_c(v, C):                                          # (1,C) -> (1,W*C)
        return jnp.tile(v.reshape(1, C).astype(f32), (1, W))

    mg1, mgT1 = gn_masks(Cin)
    mg2, mgT2 = gn_masks(Cout)
    cw1 = band_weights(params["w1"], Cin, Cout)
    cw2 = band_weights(params["w2"], Cout, Cout)
    wsd = jnp.einsum("wv,io->wivo", jnp.eye(W, dtype=f32),
                     params["ws"].astype(f32)).reshape(WCi, WCo).astype(matmul_dtype)
    consts = [
        tile_c(params["g1"], Cin), tile_c(params["be1"], Cin), mg1, mgT1,
        cw1, tile_c(params["b1"], Cout),
        tile_c(params["g2"], Cout), tile_c(params["be2"], Cout), mg2, mgT2,
        cw2, tile_c(params["b2"], Cout),
        wsd, tile_c(params["bs"], Cout),
    ]

    # Time-embedding projection hoisted out of the kernel; lane-tiled result.
    if use_time:
        tt = t.astype(f32)
        temb = jnp.dot(_swish(tt), params["tw"].astype(f32)) + \
            params["tb"].reshape(1, Cout).astype(f32)                 # (N, Cout)
        temb_lane = jnp.tile(temb, (1, W)).reshape(N, 1, WCo)
    else:
        temb_lane = jnp.zeros((N, 1, WCo), f32)

    # Lane-dense activations: NHWC folded to (N*H, W*C) (contiguous reshape).
    x_lane = jnp.transpose(x_nchw, (0, 2, 3, 1)).astype(f32) \
        .reshape(N * H, WCi).astype(io_dtype)

    kern = functools.partial(
        residual_block_kernel, H=H, W=W, Cin=Cin, Cout=Cout, nb=nb,
        use_time=use_time, identity_shortcut=identity_shortcut,
        mm_dtype=matmul_dtype)

    def cspec(a):
        nd = a.ndim
        return pl.BlockSpec(a.shape, lambda n, _nd=nd: (0,) * _nd)

    out = pl.pallas_call(
        kern,
        out_shape=jax.ShapeDtypeStruct((N * H, WCo), io_dtype),
        grid=grid,
        in_specs=[pl.BlockSpec((nb * H, WCi), lambda n: (n, 0)),
                  pl.BlockSpec((nb, 1, WCo), lambda n: (n, 0, 0))]
                 + [cspec(c) for c in consts],
        out_specs=pl.BlockSpec((nb * H, WCo), lambda n: (n, 0)),
        scratch_shapes=[pltpu.VMEM((nb, H + 2, WCi), f32),   # conv1 halo buf
                        pltpu.VMEM((nb, H + 2, WCo), f32)],  # conv2 halo buf
        compiler_params=pltpu.CompilerParams(
            dimension_semantics=("parallel",),
            vmem_limit_bytes=32 * 1024 * 1024),
    )(x_lane, temb_lane, *consts)

    out_f = out.astype(f32).reshape(N, H, W, Cout)
    return jnp.transpose(out_f, (0, 3, 1, 2))                 # back to NCHW


def init_params(key, Cin, Cout, Tc):
    ks = jax.random.split(key, 12)
    s = 0.1
    if Cin != Cout:
        ws = s * jax.random.normal(ks[10], (Cin, Cout), jnp.float32)
        bs = s * jax.random.normal(ks[11], (1, Cout), jnp.float32)
    else:
        ws = jnp.eye(Cin, dtype=jnp.float32)
        bs = jnp.zeros((1, Cout), jnp.float32)
    return {
        "g1": 1.0 + s * jax.random.normal(ks[0], (1, Cin), jnp.float32),
        "be1": s * jax.random.normal(ks[1], (1, Cin), jnp.float32),
        "w1": s * jax.random.normal(ks[2], (9, Cin, Cout), jnp.float32),
        "b1": s * jax.random.normal(ks[3], (1, Cout), jnp.float32),
        "tw": s * jax.random.normal(ks[4], (Tc, Cout), jnp.float32),
        "tb": s * jax.random.normal(ks[5], (1, Cout), jnp.float32),
        "g2": 1.0 + s * jax.random.normal(ks[6], (1, Cout), jnp.float32),
        "be2": s * jax.random.normal(ks[7], (1, Cout), jnp.float32),
        "w2": s * jax.random.normal(ks[8], (9, Cout, Cout), jnp.float32),
        "b2": s * jax.random.normal(ks[9], (1, Cout), jnp.float32),
        "ws": ws,
        "bs": bs,
    }


def reference_forward(x_nchw, t, params, *, n_groups):
    """Pure-JAX reference reproducing the PyTorch forward (eval-mode dropout)."""
    x = jnp.transpose(x_nchw, (0, 2, 3, 1)).astype(jnp.float32)

    def gn(v, gamma, beta):
        N, H, W, C = v.shape
        G = n_groups
        cg = C // G
        vr = v.reshape(N, H, W, G, cg)
        mean = vr.mean(axis=(1, 2, 4), keepdims=True)
        var = ((vr - mean) ** 2).mean(axis=(1, 2, 4), keepdims=True)
        out = ((vr - mean) / jnp.sqrt(var + 1e-5)).reshape(N, H, W, C)
        return out * gamma.reshape(1, 1, 1, C) + beta.reshape(1, 1, 1, C)

    def conv3(v, w9, b):
        Ci, Co = w9.shape[1], w9.shape[2]
        w = w9.reshape(3, 3, Ci, Co)
        y = lax.conv_general_dilated(v, w, (1, 1), "SAME",
                                     dimension_numbers=("NHWC", "HWIO", "NHWC"))
        return y + b.reshape(1, 1, 1, Co)

    sw = lambda u: u * jax.nn.sigmoid(u)
    h = conv3(sw(gn(x, params["g1"], params["be1"])), params["w1"], params["b1"])
    if t is not None:
        temb = jnp.dot(sw(t), params["tw"]) + params["tb"]            # (N, Cout)
        h = h + temb[:, None, None, :]
    h = conv3(sw(gn(h, params["g2"], params["be2"])), params["w2"], params["b2"])
    sc = jnp.einsum("nhwc,cd->nhwd", x, params["ws"]) + params["bs"].reshape(1, 1, 1, -1)
    return jnp.transpose(h + sc, (0, 3, 1, 2))


if __name__ == "__main__":
    N, Cin, Cout, H, W, Tc, G = 4, 4, 8, 16, 16, 8, 2
    key = jax.random.PRNGKey(0)
    kx, kt, kp = jax.random.split(key, 3)
    x = jax.random.normal(kx, (N, Cin, H, W), jnp.float32)            # NCHW
    t = jax.random.normal(kt, (N, Tc), jnp.float32)
    params = init_params(kp, Cin, Cout, Tc)

    ref = reference_forward(x, t, params, n_groups=G)

    # f32 MXU operands + f32 I/O: tight check against the pure-JAX reference.
    out_f32 = jax.block_until_ready(
        residual_block_forward(x, t, params, n_groups=G,
                               matmul_dtype=jnp.float32))
    assert out_f32.shape == (N, Cout, H, W)
    assert jnp.allclose(out_f32, ref, rtol=2e-2, atol=2e-2), \
        float(jnp.max(jnp.abs(out_f32 - ref)))

    # Default bf16 MXU operands + bf16 activation I/O: looser sanity check.
    out_bf16 = jax.block_until_ready(
        residual_block_forward(x, t, params, n_groups=G))
    assert out_bf16.shape == (N, Cout, H, W)
    assert jnp.allclose(out_bf16, ref, rtol=1e-1, atol=1e-1), \
        float(jnp.max(jnp.abs(out_bf16 - ref)))

    print("KERNEL_OK")
</pallas_src>

<mosaic_0001>
module attributes {stable_mosaic.version = 11 : i64} {
  func.func @residual_block_kernel(%arg0: i32, %arg1: memref<32x64xf32, #tpu.memory_space<vmem>>, %arg2: memref<2x1x128xf32, #tpu.memory_space<vmem>>, %arg3: memref<1x64xf32, #tpu.memory_space<vmem>>, %arg4: memref<1x64xf32, #tpu.memory_space<vmem>>, %arg5: memref<64x2xf32, #tpu.memory_space<vmem>>, %arg6: memref<2x64xf32, #tpu.memory_space<vmem>>, %arg7: memref<3x64x128xf32, #tpu.memory_space<vmem>>, %arg8: memref<1x128xf32, #tpu.memory_space<vmem>>, %arg9: memref<1x128xf32, #tpu.memory_space<vmem>>, %arg10: memref<1x128xf32, #tpu.memory_space<vmem>>, %arg11: memref<128x2xf32, #tpu.memory_space<vmem>>, %arg12: memref<2x128xf32, #tpu.memory_space<vmem>>, %arg13: memref<3x128x128xf32, #tpu.memory_space<vmem>>, %arg14: memref<1x128xf32, #tpu.memory_space<vmem>>, %arg15: memref<64x128xf32, #tpu.memory_space<vmem>>, %arg16: memref<1x128xf32, #tpu.memory_space<vmem>>, %arg17: memref<32x128xf32, #tpu.memory_space<vmem>>, %arg18: memref<2x18x64xf32, #tpu.memory_space<vmem>>, %arg19: memref<2x18x128xf32, #tpu.memory_space<vmem>>) attributes {dimension_semantics = [#tpu.dimension_semantics<parallel>], iteration_bounds = array<i64: 2>, scalar_prefetch = 0 : i64, scratch_operands = 2 : i64, tpu.core_type = #tpu.core_type<tc>, window_params = [{transform_indices = @transform_0, window_bounds = array<i64: 32, 64>}, {transform_indices = @transform_1, window_bounds = array<i64: 2, 1, 128>}, {pipeline_mode = #tpu.pipeline_mode<synchronous>, transform_indices = @transform_2, window_bounds = array<i64: 1, 64>}, {pipeline_mode = #tpu.pipeline_mode<synchronous>, transform_indices = @transform_3, window_bounds = array<i64: 1, 64>}, {pipeline_mode = #tpu.pipeline_mode<synchronous>, transform_indices = @transform_4, window_bounds = array<i64: 64, 2>}, {pipeline_mode = #tpu.pipeline_mode<synchronous>, transform_indices = @transform_5, window_bounds = array<i64: 2, 64>}, {pipeline_mode = #tpu.pipeline_mode<synchronous>, transform_indices = @transform_6, window_bounds = array<i64: 3, 64, 128>}, {pipeline_mode = #tpu.pipeline_mode<synchronous>, transform_indices = @transform_7, window_bounds = array<i64: 1, 128>}, {pipeline_mode = #tpu.pipeline_mode<synchronous>, transform_indices = @transform_8, window_bounds = array<i64: 1, 128>}, {pipeline_mode = #tpu.pipeline_mode<synchronous>, transform_indices = @transform_9, window_bounds = array<i64: 1, 128>}, {pipeline_mode = #tpu.pipeline_mode<synchronous>, transform_indices = @transform_10, window_bounds = array<i64: 128, 2>}, {pipeline_mode = #tpu.pipeline_mode<synchronous>, transform_indices = @transform_11, window_bounds = array<i64: 2, 128>}, {pipeline_mode = #tpu.pipeline_mode<synchronous>, transform_indices = @transform_12, window_bounds = array<i64: 3, 128, 128>}, {pipeline_mode = #tpu.pipeline_mode<synchronous>, transform_indices = @transform_13, window_bounds = array<i64: 1, 128>}, {pipeline_mode = #tpu.pipeline_mode<synchronous>, transform_indices = @transform_14, window_bounds = array<i64: 64, 128>}, {pipeline_mode = #tpu.pipeline_mode<synchronous>, transform_indices = @transform_15, window_bounds = array<i64: 1, 128>}, {transform_indices = @transform_16, window_bounds = array<i64: 32, 128>}]} {
    %c0 = arith.constant 0 : index
    %c0_0 = arith.constant 0 : index
    %0 = vector.load %arg1[%c0, %c0_0] : memref<32x64xf32, #tpu.memory_space<vmem>>, vector<32x64xf32>
    %1 = vector.shape_cast %0 : vector<32x64xf32> to vector<2x16x64xf32>
    %cst = arith.constant dense<0.000000e+00> : vector<2x64xf32>
    %2 = vector.multi_reduction <add>, %1, %cst [1] : vector<2x16x64xf32> to vector<2x64xf32>
    %c0_1 = arith.constant 0 : index
    %c0_2 = arith.constant 0 : index
    %3 = vector.load %arg5[%c0_1, %c0_2] : memref<64x2xf32, #tpu.memory_space<vmem>>, vector<64x2xf32>
    %cst_3 = arith.constant dense<0.000000e+00> : vector<2x2xf32>
    %4 = tpu.matmul %2, %3, %cst_3 {dimension_numbers = #tpu.dot_dimension_numbers<[1], [0], [0], [1], [0, 0, 1, 1], [], []>} : vector<2x64xf32>, vector<64x2xf32>, vector<2x2xf32> -> vector<2x2xf32>
    %c0_4 = arith.constant 0 : index
    %c0_5 = arith.constant 0 : index
    %5 = vector.load %arg6[%c0_4, %c0_5] : memref<2x64xf32, #tpu.memory_space<vmem>>, vector<2x64xf32>
    %cst_6 = arith.constant dense<0.000000e+00> : vector<2x64xf32>
    %6 = tpu.matmul %4, %5, %cst_6 {dimension_numbers = #tpu.dot_dimension_numbers<[1], [0], [0], [1], [0, 0, 1, 1], [], []>} : vector<2x2xf32>, vector<2x64xf32>, vector<2x64xf32> -> vector<2x64xf32>
    %7 = vector.shape_cast %6 : vector<2x64xf32> to vector<2x1x64xf32>
    %8 = vector.broadcast %7 : vector<2x1x64xf32> to vector<2x16x64xf32>
    %9 = arith.subf %1, %8 : vector<2x16x64xf32>
    %10 = arith.mulf %9, %9 : vector<2x16x64xf32>
    %cst_7 = arith.constant dense<0.000000e+00> : vector<2x64xf32>
    %11 = vector.multi_reduction <add>, %10, %cst_7 [1] : vector<2x16x64xf32> to vector<2x64xf32>
    %c0_8 = arith.constant 0 : index
    %c0_9 = arith.constant 0 : index
    %12 = vector.load %arg5[%c0_8, %c0_9] : memref<64x2xf32, #tpu.memory_space<vmem>>, vector<64x2xf32>
    %cst_10 = arith.constant dense<0.000000e+00> : vector<2x2xf32>
    %13 = tpu.matmul %11, %12, %cst_10 {dimension_numbers = #tpu.dot_dimension_numbers<[1], [0], [0], [1], [0, 0, 1, 1], [], []>} : vector<2x64xf32>, vector<64x2xf32>, vector<2x2xf32> -> vector<2x2xf32>
    %cst_11 = arith.constant 9.99999974E-6 : f32
    %14 = vector.broadcast %cst_11 : f32 to vector<2x2xf32>
    %15 = arith.addf %13, %14 : vector<2x2xf32>
    %16 = math.rsqrt %15 : vector<2x2xf32>
    %c0_12 = arith.constant 0 : index
    %c0_13 = arith.constant 0 : index
    %17 = vector.load %arg6[%c0_12, %c0_13] : memref<2x64xf32, #tpu.memory_space<vmem>>, vector<2x64xf32>
    %cst_14 = arith.constant dense<0.000000e+00> : vector<2x64xf32>
    %18 = tpu.matmul %16, %17, %cst_14 {dimension_numbers = #tpu.dot_dimension_numbers<[1], [0], [0], [1], [0, 0, 1, 1], [], []>} : vector<2x2xf32>, vector<2x64xf32>, vector<2x64xf32> -> vector<2x64xf32>
    %19 = vector.shape_cast %18 : vector<2x64xf32> to vector<2x1x64xf32>
    %20 = vector.broadcast %19 : vector<2x1x64xf32> to vector<2x16x64xf32>
    %21 = arith.mulf %9, %20 : vector<2x16x64xf32>
    %c0_15 = arith.constant 0 : index
    %c0_16 = arith.constant 0 : index
    %22 = vector.load %arg3[%c0_15, %c0_16] : memref<1x64xf32, #tpu.memory_space<vmem>>, vector<1x64xf32>
    %23 = vector.shape_cast %22 : vector<1x64xf32> to vector<1x1x64xf32>
    %24 = vector.broadcast %23 : vector<1x1x64xf32> to vector<2x16x64xf32>
    %25 = arith.mulf %21, %24 : vector<2x16x64xf32>
    %c0_17 = arith.constant 0 : index
    %c0_18 = arith.constant 0 : index
    %26 = vector.load %arg4[%c0_17, %c0_18] : memref<1x64xf32, #tpu.memory_space<vmem>>, vector<1x64xf32>
    %27 = vector.shape_cast %26 : vector<1x64xf32> to vector<1x1x64xf32>
    %28 = vector.broadcast %27 : vector<1x1x64xf32> to vector<2x16x64xf32>
    %29 = arith.addf %25, %28 : vector<2x16x64xf32>
    %30 = arith.negf %29 : vector<2x16x64xf32>
    %31 = math.exp %30 : vector<2x16x64xf32>
    %cst_19 = arith.constant 1.000000e+00 : f32
    %32 = vector.broadcast %cst_19 : f32 to vector<2x16x64xf32>
    %33 = arith.addf %32, %31 : vector<2x16x64xf32>
    %34 = arith.divf %32, %33 : vector<2x16x64xf32>
    %35 = arith.mulf %29, %34 : vector<2x16x64xf32>
    %cst_20 = arith.constant 0.000000e+00 : f32
    %36 = vector.broadcast %cst_20 : f32 to vector<2x1x64xf32>
    %c0_21 = arith.constant 0 : index
    %c0_22 = arith.constant 0 : index
    %c0_23 = arith.constant 0 : index
    %37 = vector.load %arg18[%c0_21, %c0_22, %c0_23] : memref<2x18x64xf32, #tpu.memory_space<vmem>>, vector<2x1x64xf32>
    tpu.vector_store %arg18[%c0_21, %c0_22, %c0_23], %36 {strides = array<i32>} : memref<2x18x64xf32, #tpu.memory_space<vmem>>, vector<2x1x64xf32>,
    %cst_24 = arith.constant 0.000000e+00 : f32
    %38 = vector.broadcast %cst_24 : f32 to vector<2x1x64xf32>
    %c0_25 = arith.constant 0 : index
    %c17 = arith.constant 17 : index
    %c0_26 = arith.constant 0 : index
    %39 = vector.load %arg18[%c0_25, %c17, %c0_26] : memref<2x18x64xf32, #tpu.memory_space<vmem>>, vector<2x1x64xf32>
    tpu.vector_store %arg18[%c0_25, %c17, %c0_26], %38 {strides = array<i32>} : memref<2x18x64xf32, #tpu.memory_space<vmem>>, vector<2x1x64xf32>,
    %c0_27 = arith.constant 0 : index
    %c1 = arith.constant 1 : index
    %c0_28 = arith.constant 0 : index
    %40 = vector.load %arg18[%c0_27, %c1, %c0_28] : memref<2x18x64xf32, #tpu.memory_space<vmem>>, vector<2x16x64xf32>
    tpu.vector_store %arg18[%c0_27, %c1, %c0_28], %35 {strides = array<i32>} : memref<2x18x64xf32, #tpu.memory_space<vmem>>, vector<2x16x64xf32>,
    %cst_29 = arith.constant 0.000000e+00 : f32
    %41 = vector.broadcast %cst_29 : f32 to vector<32x128xf32>
    %c0_30 = arith.constant 0 : index
    %c0_31 = arith.constant 0 : index
    %c0_32 = arith.constant 0 : index
    %42 = vector.load %arg18[%c0_30, %c0_31, %c0_32] : memref<2x18x64xf32, #tpu.memory_space<vmem>>, vector<2x16x64xf32>
    %43 = vector.shape_cast %42 : vector<2x16x64xf32> to vector<32x64xf32>
    %c0_33 = arith.constant 0 : index
    %c0_34 = arith.constant 0 : index
    %c0_35 = arith.constant 0 : index
    %44 = vector.load %arg7[%c0_33, %c0_34, %c0_35] : memref<3x64x128xf32, #tpu.memory_space<vmem>>, vector<1x64x128xf32>
    %45 = vector.shape_cast %44 : vector<1x64x128xf32> to vector<64x128xf32>
    %cst_36 = arith.constant dense<0.000000e+00> : vector<32x128xf32>
    %46 = tpu.matmul %43, %45, %cst_36 {dimension_numbers = #tpu.dot_dimension_numbers<[1], [0], [0], [1], [0, 0, 1, 1], [], []>} : vector<32x64xf32>, vector<64x128xf32>, vector<32x128xf32> -> vector<32x128xf32>
    %47 = arith.addf %41, %46 : vector<32x128xf32>
    %c0_37 = arith.constant 0 : index
    %c1_38 = arith.constant 1 : index
    %c0_39 = arith.constant 0 : index
    %48 = vector.load %arg18[%c0_37, %c1_38, %c0_39] : memref<2x18x64xf32, #tpu.memory_space<vmem>>, vector<2x16x64xf32>
    %49 = vector.shape_cast %48 : vector<2x16x64xf32> to vector<32x64xf32>
    %c1_40 = arith.constant 1 : index
    %c0_41 = arith.constant 0 : index
    %c0_42 = arith.constant 0 : index
    %50 = vector.load %arg7[%c1_40, %c0_41, %c0_42] : memref<3x64x128xf32, #tpu.memory_space<vmem>>, vector<1x64x128xf32>
    %51 = vector.shape_cast %50 : vector<1x64x128xf32> to vector<64x128xf32>
    %cst_43 = arith.constant dense<0.000000e+00> : vector<32x128xf32>
    %52 = tpu.matmul %49, %51, %cst_43 {dimension_numbers = #tpu.dot_dimension_numbers<[1], [0], [0], [1], [0, 0, 1, 1], [], []>} : vector<32x64xf32>, vector<64x128xf32>, vector<32x128xf32> -> vector<32x128xf32>
    %53 = arith.addf %47, %52 : vector<32x128xf32>
    %c0_44 = arith.constant 0 : index
    %c2 = arith.constant 2 : index
    %c0_45 = arith.constant 0 : index
    %54 = vector.load %arg18[%c0_44, %c2, %c0_45] : memref<2x18x64xf32, #tpu.memory_space<vmem>>, vector<2x16x64xf32>
    %55 = vector.shape_cast %54 : vector<2x16x64xf32> to vector<32x64xf32>
    %c2_46 = arith.constant 2 : index
    %c0_47 = arith.constant 0 : index
    %c0_48 = arith.constant 0 : index
    %56 = vector.load %arg7[%c2_46, %c0_47, %c0_48] : memref<3x64x128xf32, #tpu.memory_space<vmem>>, vector<1x64x128xf32>
    %57 = vector.shape_cast %56 : vector<1x64x128xf32> to vector<64x128xf32>
    %cst_49 = arith.constant dense<0.000000e+00> : vector<32x128xf32>
    %58 = tpu.matmul %55, %57, %cst_49 {dimension_numbers = #tpu.dot_dimension_numbers<[1], [0], [0], [1], [0, 0, 1, 1], [], []>} : vector<32x64xf32>, vector<64x128xf32>, vector<32x128xf32> -> vector<32x128xf32>
    %59 = arith.addf %53, %58 : vector<32x128xf32>
    %c0_50 = arith.constant 0 : index
    %c0_51 = arith.constant 0 : index
    %60 = vector.load %arg8[%c0_50, %c0_51] : memref<1x128xf32, #tpu.memory_space<vmem>>, vector<1x128xf32>
    %61 = vector.broadcast %60 : vector<1x128xf32> to vector<32x128xf32>
    %62 = arith.addf %59, %61 : vector<32x128xf32>
    %63 = vector.shape_cast %62 : vector<32x128xf32> to vector<2x16x128xf32>
    %c0_52 = arith.constant 0 : index
    %c0_53 = arith.constant 0 : index
    %c0_54 = arith.constant 0 : index
    %64 = vector.load %arg2[%c0_52, %c0_53, %c0_54] : memref<2x1x128xf32, #tpu.memory_space<vmem>>, vector<2x1x128xf32>
    %65 = vector.broadcast %64 : vector<2x1x128xf32> to vector<2x16x128xf32>
    %66 = arith.addf %63, %65 : vector<2x16x128xf32>
    %cst_55 = arith.constant dense<0.000000e+00> : vector<2x128xf32>
    %67 = vector.multi_reduction <add>, %66, %cst_55 [1] : vector<2x16x128xf32> to vector<2x128xf32>
    %c0_56 = arith.constant 0 : index
    %c0_57 = arith.constant 0 : index
    %68 = vector.load %arg11[%c0_56, %c0_57] : memref<128x2xf32, #tpu.memory_space<vmem>>, vector<128x2xf32>
    %cst_58 = arith.constant dense<0.000000e+00> : vector<2x2xf32>
    %69 = tpu.matmul %67, %68, %cst_58 {dimension_numbers = #tpu.dot_dimension_numbers<[1], [0], [0], [1], [0, 0, 1, 1], [], []>} : vector<2x128xf32>, vector<128x2xf32>, vector<2x2xf32> -> vector<2x2xf32>
    %c0_59 = arith.constant 0 : index
    %c0_60 = arith.constant 0 : index
    %70 = vector.load %arg12[%c0_59, %c0_60] : memref<2x128xf32, #tpu.memory_space<vmem>>, vector<2x128xf32>
    %cst_61 = arith.constant dense<0.000000e+00> : vector<2x128xf32>
    %71 = tpu.matmul %69, %70, %cst_61 {dimension_numbers = #tpu.dot_dimension_numbers<[1], [0], [0], [1], [0, 0, 1, 1], [], []>} : vector<2x2xf32>, vector<2x128xf32>, vector<2x128xf32> -> vector<2x128xf32>
    %72 = vector.shape_cast %71 : vector<2x128xf32> to vector<2x1x128xf32>
    %73 = vector.broadcast %72 : vector<2x1x128xf32> to vector<2x16x128xf32>
    %74 = arith.subf %66, %73 : vector<2x16x128xf32>
    %75 = arith.mulf %74, %74 : vector<2x16x128xf32>
    %cst_62 = arith.constant dense<0.000000e+00> : vector<2x128xf32>
    %76 = vector.multi_reduction <add>, %75, %cst_62 [1] : vector<2x16x128xf32> to vector<2x128xf32>
    %c0_63 = arith.constant 0 : index
    %c0_64 = arith.constant 0 : index
    %77 = vector.load %arg11[%c0_63, %c0_64] : memref<128x2xf32, #tpu.memory_space<vmem>>, vector<128x2xf32>
    %cst_65 = arith.constant dense<0.000000e+00> : vector<2x2xf32>
    %78 = tpu.matmul %76, %77, %cst_65 {dimension_numbers = #tpu.dot_dimension_numbers<[1], [0], [0], [1], [0, 0, 1, 1], [], []>} : vector<2x128xf32>, vector<128x2xf32>, vector<2x2xf32> -> vector<2x2xf32>
    %cst_66 = arith.constant 9.99999974E-6 : f32
    %79 = vector.broadcast %cst_66 : f32 to vector<2x2xf32>
    %80 = arith.addf %78, %79 : vector<2x2xf32>
    %81 = math.rsqrt %80 : vector<2x2xf32>
    %c0_67 = arith.constant 0 : index
    %c0_68 = arith.constant 0 : index
    %82 = vector.load %arg12[%c0_67, %c0_68] : memref<2x128xf32, #tpu.memory_space<vmem>>, vector<2x128xf32>
    %cst_69 = arith.constant dense<0.000000e+00> : vector<2x128xf32>
    %83 = tpu.matmul %81, %82, %cst_69 {dimension_numbers = #tpu.dot_dimension_numbers<[1], [0], [0], [1], [0, 0, 1, 1], [], []>} : vector<2x2xf32>, vector<2x128xf32>, vector<2x128xf32> -> vector<2x128xf32>
    %84 = vector.shape_cast %83 : vector<2x128xf32> to vector<2x1x128xf32>
    %85 = vector.broadcast %84 : vector<2x1x128xf32> to vector<2x16x128xf32>
    %86 = arith.mulf %74, %85 : vector<2x16x128xf32>
    %c0_70 = arith.constant 0 : index
    %c0_71 = arith.constant 0 : index
    %87 = vector.load %arg9[%c0_70, %c0_71] : memref<1x128xf32, #tpu.memory_space<vmem>>, vector<1x128xf32>
    %88 = vector.shape_cast %87 : vector<1x128xf32> to vector<1x1x128xf32>
    %89 = vector.broadcast %88 : vector<1x1x128xf32> to vector<2x16x128xf32>
    %90 = arith.mulf %86, %89 : vector<2x16x128xf32>
    %c0_72 = arith.constant 0 : index
    %c0_73 = arith.constant 0 : index
    %91 = vector.load %arg10[%c0_72, %c0_73] : memref<1x128xf32, #tpu.memory_space<vmem>>, vector<1x128xf32>
    %92 = vector.shape_cast %91 : vector<1x128xf32> to vector<1x1x128xf32>
    %93 = vector.broadcast %92 : vector<1x1x128xf32> to vector<2x16x128xf32>
    %94 = arith.addf %90, %93 : vector<2x16x128xf32>
    %95 = arith.negf %94 : vector<2x16x128xf32>
    %96 = math.exp %95 : vector<2x16x128xf32>
    %cst_74 = arith.constant 1.000000e+00 : f32
    %97 = vector.broadcast %cst_74 : f32 to vector<2x16x128xf32>
    %98 = arith.addf %97, %96 : vector<2x16x128xf32>
    %99 = arith.divf %97, %98 : vector<2x16x128xf32>
    %100 = arith.mulf %94, %99 : vector<2x16x128xf32>
    %cst_75 = arith.constant 0.000000e+00 : f32
    %101 = vector.broadcast %cst_75 : f32 to vector<2x1x128xf32>
    %c0_76 = arith.constant 0 : index
    %c0_77 = arith.constant 0 : index
    %c0_78 = arith.constant 0 : index
    %102 = vector.load %arg19[%c0_76, %c0_77, %c0_78] : memref<2x18x128xf32, #tpu.memory_space<vmem>>, vector<2x1x128xf32>
    tpu.vector_store %arg19[%c0_76, %c0_77, %c0_78], %101 {strides = array<i32>} : memref<2x18x128xf32, #tpu.memory_space<vmem>>, vector<2x1x128xf32>,
    %cst_79 = arith.constant 0.000000e+00 : f32
    %103 = vector.broadcast %cst_79 : f32 to vector<2x1x128xf32>
    %c0_80 = arith.constant 0 : index
    %c17_81 = arith.constant 17 : index
    %c0_82 = arith.constant 0 : index
    %104 = vector.load %arg19[%c0_80, %c17_81, %c0_82] : memref<2x18x128xf32, #tpu.memory_space<vmem>>, vector<2x1x128xf32>
    tpu.vector_store %arg19[%c0_80, %c17_81, %c0_82], %103 {strides = array<i32>} : memref<2x18x128xf32, #tpu.memory_space<vmem>>, vector<2x1x128xf32>,
    %c0_83 = arith.constant 0 : index
    %c1_84 = arith.constant 1 : index
    %c0_85 = arith.constant 0 : index
    %105 = vector.load %arg19[%c0_83, %c1_84, %c0_85] : memref<2x18x128xf32, #tpu.memory_space<vmem>>, vector<2x16x128xf32>
    tpu.vector_store %arg19[%c0_83, %c1_84, %c0_85], %100 {strides = array<i32>} : memref<2x18x128xf32, #tpu.memory_space<vmem>>, vector<2x16x128xf32>,
    %cst_86 = arith.constant 0.000000e+00 : f32
    %106 = vector.broadcast %cst_86 : f32 to vector<32x128xf32>
    %c0_87 = arith.constant 0 : index
    %c0_88 = arith.constant 0 : index
    %c0_89 = arith.constant 0 : index
    %107 = vector.load %arg19[%c0_87, %c0_88, %c0_89] : memref<2x18x128xf32, #tpu.memory_space<vmem>>, vector<2x16x128xf32>
    %108 = vector.shape_cast %107 : vector<2x16x128xf32> to vector<32x128xf32>
    %c0_90 = arith.constant 0 : index
    %c0_91 = arith.constant 0 : index
    %c0_92 = arith.constant 0 : index
    %109 = vector.load %arg13[%c0_90, %c0_91, %c0_92] : memref<3x128x128xf32, #tpu.memory_space<vmem>>, vector<1x128x128xf32>
    %110 = vector.shape_cast %109 : vector<1x128x128xf32> to vector<128x128xf32>
    %cst_93 = arith.constant dense<0.000000e+00> : vector<32x128xf32>
    %111 = tpu.matmul %108, %110, %cst_93 {dimension_numbers = #tpu.dot_dimension_numbers<[1], [0], [0], [1], [0, 0, 1, 1], [], []>} : vector<32x128xf32>, vector<128x128xf32>, vector<32x128xf32> -> vector<32x128xf32>
    %112 = arith.addf %106, %111 : vector<32x128xf32>
    %c0_94 = arith.constant 0 : index
    %c1_95 = arith.constant 1 : index
    %c0_96 = arith.constant 0 : index
    %113 = vector.load %arg19[%c0_94, %c1_95, %c0_96] : memref<2x18x128xf32, #tpu.memory_space<vmem>>, vector<2x16x128xf32>
    %114 = vector.shape_cast %113 : vector<2x16x128xf32> to vector<32x128xf32>
    %c1_97 = arith.constant 1 : index
    %c0_98 = arith.constant 0 : index
    %c0_99 = arith.constant 0 : index
    %115 = vector.load %arg13[%c1_97, %c0_98, %c0_99] : memref<3x128x128xf32, #tpu.memory_space<vmem>>, vector<1x128x128xf32>
    %116 = vector.shape_cast %115 : vector<1x128x128xf32> to vector<128x128xf32>
    %cst_100 = arith.constant dense<0.000000e+00> : vector<32x128xf32>
    %117 = tpu.matmul %114, %116, %cst_100 {dimension_numbers = #tpu.dot_dimension_numbers<[1], [0], [0], [1], [0, 0, 1, 1], [], []>} : vector<32x128xf32>, vector<128x128xf32>, vector<32x128xf32> -> vector<32x128xf32>
    %118 = arith.addf %112, %117 : vector<32x128xf32>
    %c0_101 = arith.constant 0 : index
    %c2_102 = arith.constant 2 : index
    %c0_103 = arith.constant 0 : index
    %119 = vector.load %arg19[%c0_101, %c2_102, %c0_103] : memref<2x18x128xf32, #tpu.memory_space<vmem>>, vector<2x16x128xf32>
    %120 = vector.shape_cast %119 : vector<2x16x128xf32> to vector<32x128xf32>
    %c2_104 = arith.constant 2 : index
    %c0_105 = arith.constant 0 : index
    %c0_106 = arith.constant 0 : index
    %121 = vector.load %arg13[%c2_104, %c0_105, %c0_106] : memref<3x128x128xf32, #tpu.memory_space<vmem>>, vector<1x128x128xf32>
    %122 = vector.shape_cast %121 : vector<1x128x128xf32> to vector<128x128xf32>
    %cst_107 = arith.constant dense<0.000000e+00> : vector<32x128xf32>
    %123 = tpu.matmul %120, %122, %cst_107 {dimension_numbers = #tpu.dot_dimension_numbers<[1], [0], [0], [1], [0, 0, 1, 1], [], []>} : vector<32x128xf32>, vector<128x128xf32>, vector<32x128xf32> -> vector<32x128xf32>
    %124 = arith.addf %118, %123 : vector<32x128xf32>
    %c0_108 = arith.constant 0 : index
    %c0_109 = arith.constant 0 : index
    %125 = vector.load %arg14[%c0_108, %c0_109] : memref<1x128xf32, #tpu.memory_space<vmem>>, vector<1x128xf32>
    %126 = vector.broadcast %125 : vector<1x128xf32> to vector<32x128xf32>
    %127 = arith.addf %124, %126 : vector<32x128xf32>
    %c0_110 = arith.constant 0 : index
    %c0_111 = arith.constant 0 : index
    %128 = vector.load %arg15[%c0_110, %c0_111] : memref<64x128xf32, #tpu.memory_space<vmem>>, vector<64x128xf32>
    %cst_112 = arith.constant dense<0.000000e+00> : vector<32x128xf32>
    %129 = tpu.matmul %0, %128, %cst_112 {dimension_numbers = #tpu.dot_dimension_numbers<[1], [0], [0], [1], [0, 0, 1, 1], [], []>} : vector<32x64xf32>, vector<64x128xf32>, vector<32x128xf32> -> vector<32x128xf32>
    %c0_113 = arith.constant 0 : index
    %c0_114 = arith.constant 0 : index
    %130 = vector.load %arg16[%c0_113, %c0_114] : memref<1x128xf32, #tpu.memory_space<vmem>>, vector<1x128xf32>
    %131 = vector.broadcast %130 : vector<1x128xf32> to vector<32x128xf32>
    %132 = arith.addf %129, %131 : vector<32x128xf32>
    %133 = arith.addf %127, %132 : vector<32x128xf32>
    %c0_115 = arith.constant 0 : index
    %c0_116 = arith.constant 0 : index
    %134 = vector.load %arg17[%c0_115, %c0_116] : memref<32x128xf32, #tpu.memory_space<vmem>>, vector<32x128xf32>
    tpu.vector_store %arg17[%c0_115, %c0_116], %133 {strides = array<i32>} : memref<32x128xf32, #tpu.memory_space<vmem>>, vector<32x128xf32>,
    return
  }
  func.func @transform_0(%arg0: i32) -> (i32, i32) {
    %c0_i32 = arith.constant 0 : i32
    %c0_i32_0 = arith.constant 0 : i32
    return %arg0, %c0_i32 : i32, i32
  }
  func.func @transform_1(%arg0: i32) -> (i32, i32, i32) {
    %c0_i32 = arith.constant 0 : i32
    %c0_i32_0 = arith.constant 0 : i32
    %c0_i32_1 = arith.constant 0 : i32
    return %arg0, %c0_i32, %c0_i32_0 : i32, i32, i32
  }
  func.func @transform_2(%arg0: i32) -> (i32, i32) {
    %c0_i32 = arith.constant 0 : i32
    %c0_i32_0 = arith.constant 0 : i32
    %c0_i32_1 = arith.constant 0 : i32
    return %c0_i32, %c0_i32_0 : i32, i32
  }
  func.func @transform_3(%arg0: i32) -> (i32, i32) {
    %c0_i32 = arith.constant 0 : i32
    %c0_i32_0 = arith.constant 0 : i32
    %c0_i32_1 = arith.constant 0 : i32
    return %c0_i32, %c0_i32_0 : i32, i32
  }
  func.func @transform_4(%arg0: i32) -> (i32, i32) {
    %c0_i32 = arith.constant 0 : i32
    %c0_i32_0 = arith.constant 0 : i32
    %c0_i32_1 = arith.constant 0 : i32
    return %c0_i32, %c0_i32_0 : i32, i32
  }
  func.func @transform_5(%arg0: i32) -> (i32, i32) {
    %c0_i32 = arith.constant 0 : i32
    %c0_i32_0 = arith.constant 0 : i32
    %c0_i32_1 = arith.constant 0 : i32
    return %c0_i32, %c0_i32_0 : i32, i32
  }
  func.func @transform_6(%arg0: i32) -> (i32, i32, i32) {
    %c0_i32 = arith.constant 0 : i32
    %c0_i32_0 = arith.constant 0 : i32
    %c0_i32_1 = arith.constant 0 : i32
    %c0_i32_2 = arith.constant 0 : i32
    return %c0_i32, %c0_i32_0, %c0_i32_1 : i32, i32, i32
  }
  func.func @transform_7(%arg0: i32) -> (i32, i32) {
    %c0_i32 = arith.constant 0 : i32
    %c0_i32_0 = arith.constant 0 : i32
    %c0_i32_1 = arith.constant 0 : i32
    return %c0_i32, %c0_i32_0 : i32, i32
  }
  func.func @transform_8(%arg0: i32) -> (i32, i32) {
    %c0_i32 = arith.constant 0 : i32
    %c0_i32_0 = arith.constant 0 : i32
    %c0_i32_1 = arith.constant 0 : i32
    return %c0_i32, %c0_i32_0 : i32, i32
  }
  func.func @transform_9(%arg0: i32) -> (i32, i32) {
    %c0_i32 = arith.constant 0 : i32
    %c0_i32_0 = arith.constant 0 : i32
    %c0_i32_1 = arith.constant 0 : i32
    return %c0_i32, %c0_i32_0 : i32, i32
  }
  func.func @transform_10(%arg0: i32) -> (i32, i32) {
    %c0_i32 = arith.constant 0 : i32
    %c0_i32_0 = arith.constant 0 : i32
    %c0_i32_1 = arith.constant 0 : i32
    return %c0_i32, %c0_i32_0 : i32, i32
  }
  func.func @transform_11(%arg0: i32) -> (i32, i32) {
    %c0_i32 = arith.constant 0 : i32
    %c0_i32_0 = arith.constant 0 : i32
    %c0_i32_1 = arith.constant 0 : i32
    return %c0_i32, %c0_i32_0 : i32, i32
  }
  func.func @transform_12(%arg0: i32) -> (i32, i32, i32) {
    %c0_i32 = arith.constant 0 : i32
    %c0_i32_0 = arith.constant 0 : i32
    %c0_i32_1 = arith.constant 0 : i32
    %c0_i32_2 = arith.constant 0 : i32
    return %c0_i32, %c0_i32_0, %c0_i32_1 : i32, i32, i32
  }
  func.func @transform_13(%arg0: i32) -> (i32, i32) {
    %c0_i32 = arith.constant 0 : i32
    %c0_i32_0 = arith.constant 0 : i32
    %c0_i32_1 = arith.constant 0 : i32
    return %c0_i32, %c0_i32_0 : i32, i32
  }
  func.func @transform_14(%arg0: i32) -> (i32, i32) {
    %c0_i32 = arith.constant 0 : i32
    %c0_i32_0 = arith.constant 0 : i32
    %c0_i32_1 = arith.constant 0 : i32
    return %c0_i32, %c0_i32_0 : i32, i32
  }
  func.func @transform_15(%arg0: i32) -> (i32, i32) {
    %c0_i32 = arith.constant 0 : i32
    %c0_i32_0 = arith.constant 0 : i32
    %c0_i32_1 = arith.constant 0 : i32
    return %c0_i32, %c0_i32_0 : i32, i32
  }
  func.func @transform_16(%arg0: i32) -> (i32, i32) {
    %c0_i32 = arith.constant 0 : i32
    %c0_i32_0 = arith.constant 0 : i32
    return %arg0, %c0_i32 : i32, i32
  }
}

</mosaic_0001>

<bundles_post_ra>
// kernel: tpu_custom_call.1
= control target key start
LH: loop header
LB: loop body
LE: loop exit
PB: predicated region body
PF: predicated region fallthrough
CT: control target
= control target key end

     0   :  { %s4338_s0 = inlined_call_operand.hbm [shape: f32[64,64], index: 0, kind: input, shape index: {}]   ;;  %s4339_s1 = inlined_call_operand.vmem [shape: f32[4,1,128], index: 1, kind: input, shape index: {}]   ;;  %s4340_s2 = inlined_call_operand.vmem [shape: f32[1,64], index: 2, kind: input, shape index: {}]   ;;  %s4341_s3 = inlined_call_operand.vmem [shape: f32[1,64], index: 3, kind: input, shape index: {}]   ;;  %s4342_s4 = inlined_call_operand.vmem [shape: f32[64,2], index: 4, kind: input, shape index: {}]   ;;  %s4343_s5 = inlined_call_operand.vmem [shape: f32[2,64], index: 5, kind: input, shape index: {}]   ;;  %s4344_s6 = inlined_call_operand.vmem [shape: f32[3,64,128], index: 6, kind: input, shape index: {}]   ;;  %s4345_s7 = inlined_call_operand.vmem [shape: f32[1,128], index: 7, kind: input, shape index: {}]   ;;  %s4346_s8 = inlined_call_operand.vmem [shape: f32[1,128], index: 8, kind: input, shape index: {}]   ;;  %s4347_s9 = inlined_call_operand.vmem [shape: f32[1,128], index: 9, kind: input, shape index: {}]   ;;  %s4348_s10 = inlined_call_operand.vmem [shape: f32[128,2], index: 10, kind: input, shape index: {}]   ;;  %s4349_s11 = inlined_call_operand.vmem [shape: f32[2,128], index: 11, kind: input, shape index: {}]   ;;  %s4350_s12 = inlined_call_operand.hbm [shape: f32[3,128,128], index: 12, kind: input, shape index: {}]   ;;  %s4351_s13 = inlined_call_operand.vmem [shape: f32[1,128], index: 13, kind: input, shape index: {}]   ;;  %s4352_s14 = inlined_call_operand.hbm [shape: f32[64,128], index: 14, kind: input, shape index: {}]   ;;  %s4353_s15 = inlined_call_operand.vmem [shape: f32[1,128], index: 15, kind: input, shape index: {}]   ;;  %s4354_s16 = inlined_call_operand.hbm [shape: f32[64,128], index: 16, kind: output, shape index: {}]  }
   0x1   :  { %4364 = sst [smem:[#allocation16_spill]] %s4338_s0 }
   0x2   :  { %4365 = sst [smem:[#allocation17_spill]] %s4346_s8 }
   0x3   :  { %4366 = sst [smem:[#allocation18_spill]] %s4347_s9 }
   0x4   :  { %4367 = sst [smem:[#allocation19_spill]] %s4350_s12 }
   0x5   :  { %4368 = sst [smem:[#allocation20_spill]] %s4351_s13 }
   0x6   :  { %4369 = sst [smem:[#allocation21_spill]] %s4353_s15 }
   0x7   :  { %4370 = sst [smem:[#allocation22_spill]] %s4354_s16 }
   0x8   :  { %21 = vsyncpa [#allocation5], 0 }
   0x9   :  { %23 = vsyncpa [#allocation5 + $0x1], 0 }
   0xa   :  { %24 = vsyncpa [#allocation8], 0 }
   0xb   :  { %25 = vsyncpa [#allocation6], 0 }
   0xc   :  { %27 = vsyncpa [#allocation6 + $0x1], 0  ;;  %s3696_s21 = smov 0   ;;  %s3698_s22 = smov 0  }
   0xd   :  { %s3700_s23 = smov 0   ;;  %s3702_s24 = smov 0  }
   0xe LB: > { %4371 = sst [smem:[#allocation14_spill]] %s3585_s21  ;;  %s3717_s25 = sadd.s32 4294967295, %s3597_s24   ;;  %s3597_s24 = sphi %s3702_s24, %s4400_s24   ;;  %s3593_s23 = sphi %s3700_s23, %s4399_s23   ;;  %s3589_s22 = sphi %s3698_s22, %s4398_s22   ;;  %s3585_s21 = sphi %s3696_s21, %s4397_s21  }
   0xf   : > { %s2488_s26 = sadd.s32 4294967294, %s3597_s24   ;;  %p53_p0 = scmp.ne.s32.totalorder %s3589_s22, %s3585_s21 }
  0x10   : > { %p4359_p1 = scmp.eq.s32.totalorder %s3717_s25, 0  ;;  %p403_p3 = scmp.eq.s32.totalorder %s2488_s26, 1 }
  0x11   : > { %p2489_p5 = scmp.ge.s32.totalorder %s3597_s24, 1  ;;  %p410_p7 = scmp.lt.s32.totalorder %s3597_s24, 3 }
  0x12   : > { %p3726_p4 = por %p4359_p1, %p53_p0  ;;  %p3731_p6 = por %p403_p3, %p53_p0 }
  0x13   : > { %p3736_p8 = pnand %p2489_p5, %p410_p7  ;;  %s3599_s30 = smov [#allocation7]  }
  0x14   : > { %s4372_s27 = scalar_select %p3726_p4, 1, 0 }
  0x15   : > { %s4373_s28 = scalar_select %p3731_p6, 1, 0 }
  0x16   : > { %s452_s0 = sshll.u32 %s3599_s30, 4  ;;  %p3338_p9 = pneg %p3736_p8  ;;  %s3740_s0 = int_to_ptr.vmem [resolvable:$true] %s452_s0 }
  0x17   : > { %4374 = sst [smem:[#allocation15_spill]] %s4373_s28  ;;  %s3600_s18 = smov [#allocation9]  }
  0x18   : > { %p3747_p11 = pnand %p3338_p9, %p4359_p1  ;;  %s468_s19 = sshll.u32 %s3600_s18, 4  ;;  %s3751_s19 = int_to_ptr.vmem [resolvable:$true] %s468_s19 }
  0x19   : > { %s4377_s12 = sld [smem:[#allocation19_spill]] }
  0x1a   : > { %p3443_p13 = pneg %p3747_p11 }
  0x1f   : > { %s3441_s30 = scalar_lea.hbm %s4377_s12, 6144 }
  0x20   : > { %p3442_p12 = scmp.ne.s32.totalorder %s4377_s12, %s3441_s30  ;;  %p3448_p5 = scmp.lt.u32.totalorder %s3441_s30, %s4377_s12 }
  0x22   : > { %p3444_p0 = pnand %p3443_p13, %p3442_p12 }
  0x24   : > { %p3445_p3 = pneg %p3444_p0 }
  0x26   : > { %p3450_p7 = pnand %p3448_p5, %p3445_p3 }
  0x28   : > { %3453 = shalt.err (!%p3450_p7)
}
  0x29   : > { %s3454_s18 = scalar_lea.vmem %s3740_s0, 6144  ;;  %p3462_p2 = scmp.lt.s32.totalorder %s3740_s0, %s3740_s0 }
  0x2a   : > { %p3455_p9 = scmp.ne.s32.totalorder %s3740_s0, %s3454_s18  ;;  %p3463_p12 = scmp.lt.s32.totalorder %s3454_s18, %s3454_s18 }
  0x2c   : > { %p3457_p10 = pnand %p3455_p9, %p3443_p13  ;;  %p3464_p0 = por %p3463_p12, %p3462_p2 }
  0x2e   : > { %p3458_p1 = pneg %p3457_p10 }
  0x30   : > { %p3465_p6 = pnand %p3464_p0, %p3458_p1 }
  0x32   : > { %3468 = shalt.err (!%p3465_p6)
}
  0x33   : > { %s4360_s15 = smov 128   ;;  %s4361_s16 = smov 8  }
  0x34   : > { %3341 = dma.hbm_to_vmem [thread:$0]  (!%p3747_p11), %s4377_s12, 6144, %s3740_s0, [#allocation8], %s4360_s15, %s4360_s15, %s4361_s16  }
  0x35   : > { %s3469_s30 = scalar_lea.hbm %s4352_s14, 1024 }
  0x36   : > { %p3470_p1 = scmp.ne.s32.totalorder %s4352_s14, %s3469_s30  ;;  %p3476_p10 = scmp.lt.u32.totalorder %s3469_s30, %s4352_s14 }
  0x38   : > { %p3472_p2 = pnand %p3470_p1, %p3443_p13 }
  0x3a   : > { %p3473_p6 = pneg %p3472_p2 }
  0x3c   : > { %p3478_p3 = pnand %p3476_p10, %p3473_p6 }
  0x3e   : > { %3481 = shalt.err (!%p3478_p3)
}
  0x3f   : > { %s3482_s0 = scalar_lea.vmem %s3751_s19, 1024  ;;  %p3490_p12 = scmp.lt.s32.totalorder %s3751_s19, %s3751_s19 }
  0x40   : > { %p3483_p5 = scmp.ne.s32.totalorder %s3751_s19, %s3482_s0  ;;  %p3491_p0 = scmp.lt.s32.totalorder %s3482_s0, %s3482_s0 }
  0x42   : > { %p3485_p7 = pnand %p3483_p5, %p3443_p13  ;;  %p3492_p1 = por %p3491_p0, %p3490_p12 }
  0x44   : > { %p3486_p9 = pneg %p3485_p7 }
  0x46   : > { %p3493_p2 = pnand %p3492_p1, %p3486_p9 }
  0x48   : > { %3496 = shalt.err (!%p3493_p2)
}
  0x49   : > { %3344 = dma.hbm_to_vmem [thread:$0]  (!%p3747_p11), %s4352_s14, 1024, %s3751_s19, [#allocation8], %s4360_s15, %s4360_s15, %s4361_s16  }
  0x4a   : > { %s3812_s13 = sadd.s32 1, %s3597_s24   ;;  %s40_s17 = sadd.s32 1, %s3593_s23 }
  0x4b   : > { %s37_s21 = ssub.s32 %s3597_s24, %s3812_s13  ;;  %p47_p13 = scmp.ne.s32.totalorder %s3593_s23, %s3589_s22 }
  0x4c   : > { %p38_p6 = scmp.eq.s32.totalorder %s37_s21, 0  ;;  %p48_p10 = scmp.eq.s32.totalorder %s3597_s24, 0 }
  0x4d   : > { %p4378_p3 = scmp.eq.s32.totalorder %s3717_s25, 1  ;;  %p3355_p7 = scmp.lt.s32.totalorder %s3597_s24, 2 }
  0x4e   : > { %s3828_s20 = scalar_select %p38_p6, %s3593_s23, %s40_s17  }
  0x4f   : > { %p3822_p5 = por %p4378_p3, %p47_p13  ;;  %p49_p9 = por %p48_p10, %p47_p13 }
  0x50   : > { %s485_s26 = sand.u32 1, %s3593_s23   ;;  %s2566_s19 = sshll.u32 %s3597_s24, 9 }
  0x51   : > { %s4379_s28 = scalar_select %p3822_p5, 1, 0 }
  0x52   : > { %s2493_s30 = sshll.u32 %s485_s26, 5  ;;  %s4380_s8 = sld [smem:[#allocation16_spill]] }
  0x53   : > { %s489_s21 = scalar_lea.vmem [#allocation4], %s2493_s30  ;;  %p3839_p11 = pnand %p3355_p7, %p49_p9 }
  0x54   : > { %s496_s15 = sshll.u32 %s489_s21, 4  ;;  %s3843_s16 = scalar_lea.sflag [#allocation5], %s485_s26  ;;  %s3837_s15 = int_to_ptr.vmem [resolvable:$true] %s496_s15 }
  0x55   : > { %p3499_p0 = pneg %p3839_p11 }
  0x58   : > { %s3835_s9 = scalar_lea.hbm %s4380_s8, %s2566_s19  ;;  %s3502_s18 = scalar_lea.hbm %s4380_s8, 1024 }
  0x59   : > { %s3497_s12 = scalar_lea.hbm %s3835_s9, 512  ;;  %p3503_p13 = scmp.lt.u32.totalorder %s3835_s9, %s4380_s8 }
  0x5a   : > { %p3498_p12 = scmp.ne.s32.totalorder %s3835_s9, %s3497_s12  ;;  %p3504_p6 = scmp.lt.u32.totalorder %s3502_s18, %s3497_s12 }
  0x5b   : > { %p3506_p3 = scmp.lt.u32.totalorder %s3497_s12, %s3835_s9 }
  0x5c   : > { %p3500_p1 = pnand %p3499_p0, %p3498_p12  ;;  %p3505_p10 = por %p3504_p6, %p3503_p13 }
  0x5e   : > { %p3501_p2 = pneg %p3500_p1  ;;  %p3507_p7 = por %p3506_p3, %p3505_p10 }
  0x60   : > { %p3508_p9 = pnand %p3507_p7, %p3501_p2 }
  0x62   : > { %3511 = shalt.err (!%p3508_p9)
}
  0x63   : > { %s3512_s26 = scalar_lea.vmem %s3837_s15, 512  ;;  %s3603_s30 = smov [#allocation4]  }
  0x64   : > { %p3513_p12 = scmp.ne.s32.totalorder %s3837_s15, %s3512_s26  ;;  %s3517_s19 = sshll.u32 %s3603_s30, 4  ;;  %s3518_s19 = int_to_ptr.vmem [resolvable:$false] %s3517_s19 }
  0x65   : > { %s3519_s0 = scalar_lea.vmem %s3518_s19, 1024  ;;  %p3520_p4 = scmp.lt.s32.totalorder %s3837_s15, %s3518_s19 }
  0x66   : > { %p3515_p1 = pnand %p3513_p12, %p3499_p0  ;;  %p3521_p13 = scmp.lt.s32.totalorder %s3519_s0, %s3512_s26 }
  0x68   : > { %p3516_p5 = pneg %p3515_p1  ;;  %p3522_p6 = por %p3521_p13, %p3520_p4 }
  0x6a   : > { %p3523_p10 = pnand %p3522_p6, %p3516_p5 }
  0x6c   : > { %3526 = shalt.err (!%p3523_p10)
}
  0x6d   : > { %s4382_s12 = smov 8   ;;  %s4383_s18 = smov 128  }
  0x6e   : > { %3348 = dma.hbm_to_vmem [thread:$0]  (!%p3839_p11), %s3835_s9, 512, %s3837_s15, %s3843_s16, %s4383_s18, %s4383_s18, %s4382_s12  }
  0x6f   : > { %516 = sbr.rel (%p3736_p8) target bundleno = 2567 (0xa07), region = 84  ;;  %s3877_s21 = sand.u32 (!%p3736_p8), 1, %s3589_s22  }
  0x70   : > { %s2497_s26 = sshll.u32 (!%p3736_p8), %s3877_s21, 5  ;;  %s519_s30 = scalar_lea.sflag (!%p3736_p8), [#allocation5], %s3877_s21 }
  0x71   : > { %s3883_s17 = scalar_lea.vmem (!%p3736_p8), [#allocation4], %s2497_s26  ;;  %p4384_p4 = scmp.ne.s32.totalorder (!%p3736_p8), %s4372_s27, 0 }
  0x76   : > { %3572 = dma.done.wait (%p4384_p4), %s519_s30, 512  }
  0x77   : > { %3574 = vsyncadd (%p4384_p4), %s519_s30, 4294966784  ;;  %p4385_p5 = scmp.eq.s32.totalorder %s3717_s25, 0 }
  0x79   : > { %3576 = dma.done.wait (%p4385_p5), [#allocation8], 7168   ;;  %p4386_p8 = pmov %p4385_p5 }
  0x7a   : > { %v3604_v0 = vmov 0.0|0.0   ;;  %vm3605_vm0 = vmmov 0   ;;  %v3606_v1 = vmov 0.0   ;;  %v613_v2 = vld [vmem:[%s4342_s4] sm:$0xff]  ;;  %v614_v3 = vld [vmem:[%s4342_s4 + $0x8] sm:$0xff]  ;;  %v615_v4 = vld [vmem:[%s4342_s4 + $0x10] sm:$0xff]  ;;  %v780_v42 = vlaneseq }
  0x7b   : > { %3578 = vsyncadd (%p4386_p8), [#allocation8], 4294960128  ;;  %3066 = vmatprep.subr.bf16.mxu0 %v3604_v0  ;;  %2752 = vmatprep.mubr.msk.f32.mxu0 %vm3605_vm0, %v3606_v1  ;;  %1913 = vst [vmem:[#allocation3] sm:$0x1] %v3606_v1  ;;  %vm594_vm1 = vcmask 523264   ;;  %v3067_v5 = vpack.c.bf16 %v614_v3, %v613_v2  ;;  %v616_v6 = vld [vmem:[%s4342_s4 + $0x18] sm:$0xff] }
  0x7c   : > { %1914 = vst [vmem:[#allocation3 + $0x18] sm:$0x1] %v3606_v1  ;;  %1915 = vst [vmem:[#allocation3 + $0x11] sm:$0x1] %v3606_v1  ;;  %2755 = vmatprep.subr.mxu1 %v3606_v1  ;;  %2757 = vmatprep.mubr.msk.f32.mxu1 %vm3605_vm0, %v3606_v1  ;;  %v3916_v7 = vld [vmem:[%s3883_s17] sm:$0xff]  ;;  %v3070_v8 = vpack.c.bf16 %v616_v6, %v615_v4  ;;  %v3919_v9 = vld [vmem:[%s3883_s17 + $0x8] sm:$0xff] }
  0x7d   : > { %1916 = vst [vmem:[#allocation3 + $0x29] sm:$0x1] %v3606_v1  ;;  %3068 = vmatpush3.bf16.msra.mxu0 %v3067_v5  ;;  %v3922_v10 = vld [vmem:[%s3883_s17 + $0x10] sm:$0xff]  ;;  %v3925_v11 = vld [vmem:[%s3883_s17 + $0x18] sm:$0xff]  ;;  %v595_v12 = vsel %vm594_vm1, %v3916_v7, 0.0  ;;  %v617_v13 = vld [vmem:[%s4342_s4 + $0x20] sm:$0xff] }
  0x7e   : > { %3069 = vmatprep.subr.bf16.mxu0 %v3604_v0  ;;  %v618_v14 = vld [vmem:[%s4342_s4 + $0x28] sm:$0xff]  ;;  %v596_v15 = vsel %vm594_vm1, %v3919_v9, 0.0  ;;  %v604_v16 = vsel %vm594_vm1, %v3922_v10, 0.0  ;;  %v605_v17 = vsel %vm594_vm1, %v3925_v11, 0.0  ;;  %v619_v23 = vld [vmem:[%s4342_s4 + $0x30] sm:$0xff]  ;;  %v620_v24 = vld [vmem:[%s4342_s4 + $0x38] sm:$0xff] }
  0x7f   : > { %v597_v18 = vadd.f32 %v596_v15, %v595_v12  ;;  %v606_v19 = vadd.f32 %v605_v17, %v604_v16  ;;  %v3073_v20 = vpack.c.bf16 %v618_v14, %v617_v13  ;;  %v3076_v27 = vpack.c.bf16 %v620_v24, %v619_v23  ;;  %v697_v37 = vld [vmem:[%s4343_s5] sm:$0x3]  ;;  %s2501_s9 = sshll.u32 %s3717_s25, 1  ;;  %s4387_s15 = sld [smem:[#allocation17_spill]] }
  0x80   : > { %vm623_vm2 = vcmask 1041409   ;;  %vm702_vm3 = vcmask 1041408   ;;  %vm698_vm4 = vcmask 15360   ;;  %v3607_v40 = vmov 1966171168   ;;  %v2514_v24 = vld [vmem:[%s4344_s6 + $0x40] sm:$0xff] }
  0x81   : > { %3071 = vmatpush3.bf16.msra.mxu0 %v3070_v8  ;;  %v598_v21 = vrot.slane %v597_v18, 4  ;;  %v607_v22 = vrot.slane %v606_v19, 4  ;;  %2756 = vmatpush3.msk.msra.mxu1 %vm702_vm3, %v697_v37  ;;  %v778_v41 = vunpack.c.l.s4 %v3607_v40  ;;  %v781_v44 = vshrl.u32 %v780_v42, 7  ;;  %v1457_v40 = vld [vmem:[%s4348_s10 + $0x8] sm:$0xff]  ;;  %p585_p11 = scmp.lt.s32.totalorder %s2501_s9, 3  ;;  %s4388_s19 = sld [smem:[#allocation18_spill]] }
  0x82   : > { %3072 = vmatprep.subr.bf16.mxu0 %v3604_v0  ;;  %vm1071_vm5 = vcmask 516096   ;;  %s4389_s18 = sld [smem:[#allocation20_spill]]  ;;  %s4390_s29 = sld [smem:[#allocation21_spill]] }
  0x83   : > { %v599_v25 = vadd.f32 %v598_v21, %v597_v18  ;;  %v608_v26 = vadd.f32 %v607_v22, %v606_v19  ;;  %v779_v43 = vunpack.c.0.s8 %v778_v41  ;;  %v3967_v48 = vsub.s32 0, %v781_v44  ;;  %1072 = vst.msk [vmem:[#allocation2] sm:$0x1] %vm1071_vm5, %v3606_v1  ;;  %1073 = vst.msk [vmem:[#allocation2 + $0x18] sm:$0x1] %vm1071_vm5, %v3606_v1  ;;  %v1458_v41 = vld [vmem:[%s4348_s10 + $0x10] sm:$0xff] }
  0x84   : > { %1074 = vst.msk [vmem:[#allocation2 + $0x11] sm:$0x1] %vm1071_vm5, %v3606_v1  ;;  %1075 = vst.msk [vmem:[#allocation2 + $0x29] sm:$0x1] %vm1071_vm5, %v3606_v1  ;;  %s4402_s9 = smov (!%p585_p11, %s2501_s9), 3  ;;  %s2567_s16 = sshll.u32 %s3717_s25, 9 }
  0x85   : > { %3074 = vmatpush3.bf16.msra.mxu0 %v3073_v20  ;;  %v600_v28 = vrot.slane %v599_v25, 2  ;;  %v609_v29 = vrot.slane %v608_v26, 2  ;;  %v3964_v45 = vsub.s32 %v779_v43, %v781_v44  ;;  %v1459_v43 = vld [vmem:[%s4348_s10 + $0x18] sm:$0xff]  ;;  %s587_s12 = scalar_lea.vmem %s4339_s1, %s4402_s9  ;;  %s2374_s25 = scalar_lea.sflag [#allocation6], %s3877_s21 }
  0x86   : > { %3075 = vmatprep.subr.bf16.mxu0 %v3604_v0  ;;  %v4058_v44 = vpack.c.bf16 %v1459_v43, %v1458_v41  ;;  %v2530_v41 = vld [vmem:[%s4344_s6 + $0x80] sm:$0xff]  ;;  %v2531_v43 = vld [vmem:[%s4344_s6 + $0x88] sm:$0xff]  ;;  %p4392_p2 = scmp.ne.s32.totalorder %s4379_s28, 0 }
  0x87   : > { %v601_v30 = vadd.f32 %v600_v28, %v599_v25  ;;  %v610_v31 = vadd.f32 %v609_v29, %v608_v26  ;;  %v2515_v25 = vld [vmem:[%s4344_s6 + $0x48] sm:$0xff]  ;;  %v2517_v28 = vld [vmem:[%s4344_s6 + $0x58] sm:$0xff] }
  0x88   : > { %v3090_v26 = vpack.c.bf16 %v2515_v25, %v2514_v24 }
  0x89   : > { %3077 = vmatpush3.bf16.msra.mxu0 %v3076_v27  ;;  %v602_v32 = vrot.slane %v601_v30, 1  ;;  %v611_v33 = vrot.slane %v610_v31, 1 }
  0x8a   : > { %3078 = vmatprep.subr.bf16.mxu0 %v3604_v0  ;;  %3091 = vmatprep.subr.bf16.mxu1 %v3090_v26 }
  0x8b   : > { %v603_v34 = vadd.f32 %v602_v32, %v601_v30  ;;  %v612_v35 = vadd.f32 %v611_v33, %v610_v31  ;;  %v2518_v30 = vld [vmem:[%s4344_s6 + $0x60] sm:$0xff]  ;;  %v2519_v31 = vld [vmem:[%s4344_s6 + $0x68] sm:$0xff]  ;;  %v2520_v33 = vld [vmem:[%s4344_s6 + $0x70] sm:$0xff] }
  0x8c   : > { %v3098_v32 = vpack.c.bf16 %v2519_v31, %v2518_v30 }
  0x8d   : > { %v624_v36 = vsel %vm623_vm2, %v612_v35, %v603_v34  ;;  %v2521_v34 = vld [vmem:[%s4344_s6 + $0x78] sm:$0xff] }
  0x8e   : > { %2753 = vmatmul.mubr.msk.f32.vlgmr.msra.gmra.mrb[0].mxu0 %vm594_vm1, %v624_v36  ;;  %v3102_v35 = vpack.c.bf16 %v2521_v34, %v2520_v33  ;;  %v1084_v36 = vld [vmem:[%s4344_s6] sm:$0xff]  ;;  %v1089_v33 = vld [vmem:[%s4344_s6 + $0x28] sm:$0xff] }
  0x8f   : > { %3080 = vmatpush3.bf16.msra.mxu0 %v3067_v5  ;;  %2776 = vmatprep.mubr.msk.f32.mxu0 %vm3605_vm0, %v3606_v1 }
  0x90   : > { %3081 = vmatprep.subr.bf16.mxu0 %v3604_v0 }
  0x93   : > { %3083 = vmatpush3.bf16.msra.mxu0 %v3070_v8 }
  0x94   : > { %3084 = vmatprep.subr.bf16.mxu0 %v3604_v0 }
  0x97   : > { %3086 = vmatpush3.bf16.msra.mxu0 %v3073_v20 }
  0x98   : > { %3087 = vmatprep.subr.bf16.mxu0 %v3604_v0 }
  0x9b   : > { %3089 = vmatpush3.bf16.msra.mxu0 %v3076_v27  ;;  %v2516_v27 = vld [vmem:[%s4344_s6 + $0x50] sm:$0xff] }
  0x9c   : > { %2779 = vmatprep.subr.mxu0 %v3606_v1  ;;  %v3094_v29 = vpack.c.bf16 %v2517_v28, %v2516_v27  ;;  %v1086_v27 = vld [vmem:[%s4344_s6 + $0x10] sm:$0xff]  ;;  %v1087_v28 = vld [vmem:[%s4344_s6 + $0x18] sm:$0xff] }
  0x9d   : > { %v3110_v30 = vpack.c.bf16 %v1087_v28, %v1086_v27 }
 0x161   : > { %v693_v38 = vpop.f32.mrb[0].mxu0 }
 0x162   : > { %v2754_v39 = vpop.f32.mrb[1].mxu0  ;;  %2758 = vmatmul.mubr.msk.f32.vlgmr.msra.gmra.mrb[0].mxu1 %vm698_vm4, %v693_v38 }
 0x163   : > { %3093 = vmatpush3.bf16.msra.mxu1 %v3090_v26  ;;  %v1456_v39 = vld [vmem:[%s4348_s10] sm:$0xff] }
 0x164   : > { %3095 = vmatprep.subr.bf16.mxu1 %v3094_v29  ;;  %v4052_v42 = vpack.c.bf16 %v1457_v40, %v1456_v39  ;;  %v1091_v39 = vld [vmem:[%s4344_s6 + $0x38] sm:$0xff] }
 0x167   : > { %3097 = vmatpush3.bf16.msra.mxu1 %v3094_v29 }
 0x168   : > { %3099 = vmatprep.subr.bf16.mxu1 %v3098_v32 }
 0x16b   : > { %3101 = vmatpush3.bf16.msra.mxu1 %v3098_v32  ;;  %v1088_v32 = vld [vmem:[%s4344_s6 + $0x20] sm:$0xff] }
 0x16c   : > { %3103 = vmatprep.subr.bf16.mxu1 %v3102_v35 }
 0x16f   : > { %3105 = vmatpush3.bf16.msra.mxu1 %v3102_v35  ;;  %v3114_v35 = vpack.c.bf16 %v1089_v33, %v1088_v32 }
 0x235   : > { %v772_v46 = vpop.f32.mrb[0].mxu1 }
 0x236   : > { %v783_v47 = vrot.slane %v772_v46, %v3964_v45  ;;  %v2759_v49 = vpop.f32.mrb[1].mxu1 }
 0x238   : > { %v784_v50 = vcombine.high %v783_v47, %v783_v47  ;;  %v791_v51 = vrot.slane %v783_v47, %v3964_v45 }
 0x23a   : > { %v798_v52 = vrot.slane %v784_v50, %v3964_v45  ;;  %v802_v53 = vrot.slane %v791_v51, %v3967_v48 }
 0x23c   : > { %v806_v54 = vrot.slane %v798_v52, %v3967_v48  ;;  %v3974_v55 = vsub.f32 %v3916_v7, %v802_v53  ;;  %v3977_v56 = vsub.f32 %v3919_v9, %v802_v53 }
 0x23e   : > { %v3980_v57 = vsub.f32 %v3922_v10, %v806_v54  ;;  %v3983_v58 = vsub.f32 %v3925_v11, %v806_v54  ;;  %v813_v59 = vmul.f32 %v3974_v55, %v3974_v55  ;;  %v814_v60 = vmul.f32 %v3977_v56, %v3977_v56  ;;  %v2508_v54 = vld [vmem:[%s4340_s2] ss:$0 sm:$0xff] }
 0x240   : > { %v815_v61 = vmul.f32 %v3980_v57, %v3980_v57  ;;  %v816_v62 = vmul.f32 %v3983_v58, %v3983_v58  ;;  %v817_v63 = vsel %vm594_vm1, %v813_v59, 0.0  ;;  %v818_v2 = vsel %vm594_vm1, %v814_v60, 0.0 }
 0x241   : > { %v819_v3 = vadd.f32 %v818_v2, %v817_v63 }
 0x242   : > { %v826_v4 = vsel %vm594_vm1, %v815_v61, 0.0  ;;  %v827_v5 = vsel %vm594_vm1, %v816_v62, 0.0  ;;  %v2509_v62 = vld [vmem:[%s4341_s3] ss:$0 sm:$0xff] }
 0x243   : > { %v820_v6 = vrot.slane %v819_v3, 4  ;;  %v828_v7 = vadd.f32 %v827_v5, %v826_v4 }
 0x245   : > { %v821_v8 = vadd.f32 %v820_v6, %v819_v3  ;;  %v829_v9 = vrot.slane %v828_v7, 4 }
 0x247   : > { %v822_v10 = vrot.slane %v821_v8, 2  ;;  %v830_v11 = vadd.f32 %v829_v9, %v828_v7 }
 0x249   : > { %v823_v12 = vadd.f32 %v822_v10, %v821_v8  ;;  %v831_v13 = vrot.slane %v830_v11, 2 }
 0x24b   : > { %v824_v14 = vrot.slane %v823_v12, 1  ;;  %v832_v15 = vadd.f32 %v831_v13, %v830_v11 }
 0x24d   : > { %v833_v16 = vrot.slane %v832_v15, 1  ;;  %v825_v17 = vadd.f32 %v824_v14, %v823_v12 }
 0x24f   : > { %v834_v18 = vadd.f32 %v833_v16, %v832_v15 }
 0x251   : > { %v837_v19 = vsel %vm623_vm2, %v834_v18, %v825_v17 }
 0x252   : > { %2777 = vmatmul.mubr.msk.f32.vlgmr.msra.gmra.mrb[2].mxu0 %vm594_vm1, %v837_v19 }
 0x253   : > { %2780 = vmatpush3.msk.msra.mxu0 %vm702_vm3, %v697_v37  ;;  %2781 = vmatprep.mubr.msk.f32.mxu0 %vm3605_vm0, %v3606_v1  ;;  %v1085_v37 = vld [vmem:[%s4344_s6 + $0x8] sm:$0xff] }
 0x254   : > { %3138 = vmatprep.subr.bf16.mxu0 %v3604_v0  ;;  %v4040_v38 = vpack.c.bf16 %v1085_v37, %v1084_v36  ;;  %v1090_v37 = vld [vmem:[%s4344_s6 + $0x30] sm:$0xff] }
 0x256   : > { %3107 = vmatprep.subr.bf16.mxu1 %v4040_v38 }
 0x325   : > { %v906_v20 = vpop.f32.mrb[2].mxu0 }
 0x326   : > { %v907_v21 = vadd.f32 1e-05, %v906_v20  ;;  %v2778_v22 = vpop.f32.mrb[3].mxu0 }
 0x328   : > { %3401 = vrsqrt.f32 %v907_v21 }
 0x332   : > { %v3402_v23 = vpop.eup %3401 }
 0x333   : > { %2782 = vmatmul.mubr.msk.f32.vlgmr.msra.gmra.mrb[4].mxu0 %vm698_vm4, %v3402_v23 }
 0x334   : > { %2882 = vmatprep.mubr.msk.f32.mxu0 %vm3605_vm0, %v3606_v1  ;;  %3140 = vmatpush3.bf16.msra.mxu0 %v4052_v42 }
 0x335   : > { %3141 = vmatprep.subr.bf16.mxu0 %v3604_v0 }
 0x338   : > { %3143 = vmatpush3.bf16.msra.mxu0 %v4058_v44 }
 0x339   : > { %3144 = vmatprep.subr.bf16.mxu0 %v3604_v0 }
 0x406   : > { %v980_v46 = vpop.f32.mrb[4].mxu0 }
 0x407   : > { %v991_v47 = vrot.slane %v980_v46, %v3964_v45  ;;  %v2783_v49 = vpop.f32.mrb[5].mxu0  ;;  %v3122_v46 = vpack.c.bf16 %v2531_v43, %v2530_v41 }
 0x408   : > { %v2533_v49 = vld [vmem:[%s4344_s6 + $0x98] sm:$0xff] }
 0x409   : > { %v992_v50 = vcombine.high %v991_v47, %v991_v47  ;;  %v999_v51 = vrot.slane %v991_v47, %v3964_v45  ;;  %v2532_v47 = vld [vmem:[%s4344_s6 + $0x90] sm:$0xff] }
 0x40b   : > { %v1006_v52 = vrot.slane %v992_v50, %v3964_v45  ;;  %v1010_v53 = vrot.slane %v999_v51, %v3967_v48  ;;  %v3126_v50 = vpack.c.bf16 %v2533_v49, %v2532_v47 }
 0x40d   : > { %v1014_v59 = vrot.slane %v1006_v52, %v3967_v48  ;;  %v1017_v60 = vmul.f32 %v1010_v53, %v3974_v55  ;;  %v1018_v61 = vmul.f32 %v1010_v53, %v3977_v56  ;;  %v2534_v52 = vld [vmem:[%s4344_s6 + $0xa0] sm:$0xff]  ;;  %v2535_v53 = vld [vmem:[%s4344_s6 + $0xa8] sm:$0xff] }
 0x40f   : > { %v1019_v63 = vmul.f32 %v1014_v59, %v3980_v57  ;;  %v1020_v2 = vmul.f32 %v1014_v59, %v3983_v58  ;;  %v1028_v3 = vmul.f32 %v2508_v54, %v1017_v60  ;;  %v1029_v4 = vmul.f32 %v2508_v54, %v1018_v61  ;;  %v2536_v61 = vld [vmem:[%s4344_s6 + $0xb0] sm:$0xff] }
 0x410   : > { %v3130_v59 = vpack.c.bf16 %v2535_v53, %v2534_v52 }
 0x411   : > { %v1030_v5 = vmul.f32 %v2508_v54, %v1019_v63  ;;  %v1031_v6 = vmul.f32 %v2508_v54, %v1020_v2  ;;  %v1039_v7 = vadd.f32 %v2509_v62, %v1028_v3  ;;  %v1040_v8 = vadd.f32 %v2509_v62, %v1029_v4 }
 0x413   : > { %v1041_v9 = vadd.f32 %v2509_v62, %v1030_v5  ;;  %v1042_v10 = vadd.f32 %v2509_v62, %v1031_v6  ;;  %v2510_v11 = vmul.f32 -1.442695, %v1039_v7  ;;  %v2511_v55 = vmul.f32 -1.442695, %v1040_v8  ;;  %v2537_v62 = vld [vmem:[%s4344_s6 + $0xb8] sm:$0xff]  ;;  %v1460_v6 = vld [vmem:[%s4348_s10 + $0x20] sm:$0xff] }
 0x414   : > { %v3134_v2 = vpack.c.bf16 %v2537_v62, %v2536_v61 }
 0x415   : > { %3403 = vpow2.f32 %v2510_v11  ;;  %v2512_v56 = vmul.f32 -1.442695, %v1041_v9  ;;  %v2513_v12 = vmul.f32 -1.442695, %v1042_v10 }
 0x416   : > { %3405 = vpow2.f32 %v2511_v55  ;;  %v1464_v55 = vld [vmem:[%s4348_s10 + $0x40] sm:$0xff] }
 0x417   : > { %3407 = vpow2.f32 %v2512_v56  ;;  %v1465_v56 = vld [vmem:[%s4348_s10 + $0x48] sm:$0xff] }
 0x418   : > { %3409 = vpow2.f32 %v2513_v12  ;;  %v4166_v12 = vpack.c.bf16 %v1465_v56, %v1464_v55 }
 0x41f   : > { %v3404_v13 = vpop.eup %3403 }
 0x420   : > { %v3406_v57 = vpop.eup %3405  ;;  %v1055_v14 = vadd.f32 1.0, %v3404_v13  ;;  %v1466_v13 = vld [vmem:[%s4348_s10 + $0x50] sm:$0xff] }
 0x421   : > { %v3408_v58 = vpop.eup %3407  ;;  %v1056_v15 = vadd.f32 1.0, %v3406_v57  ;;  %v1467_v57 = vld [vmem:[%s4348_s10 + $0x58] sm:$0xff] }
 0x422   : > { %v3410_v16 = vpop.eup %3409  ;;  %v1057_v17 = vadd.f32 1.0, %v3408_v58  ;;  %3411 = vrcp.f32 %v1055_v14  ;;  %v4176_v14 = vpack.c.bf16 %v1467_v57, %v1466_v13  ;;  %v1468_v58 = vld [vmem:[%s4348_s10 + $0x60] sm:$0xff] }
 0x423   : > { %v1058_v18 = vadd.f32 1.0, %v3410_v16  ;;  %3413 = vrcp.f32 %v1056_v15  ;;  %v1469_v15 = vld [vmem:[%s4348_s10 + $0x68] sm:$0xff] }
 0x424   : > { %3415 = vrcp.f32 %v1057_v17  ;;  %v4186_v16 = vpack.c.bf16 %v1469_v15, %v1468_v58  ;;  %v1470_v17 = vld [vmem:[%s4348_s10 + $0x70] sm:$0xff] }
 0x425   : > { %3417 = vrcp.f32 %v1058_v18  ;;  %v1471_v18 = vld [vmem:[%s4348_s10 + $0x78] sm:$0xff] }
 0x42c   : > { %v3412_v19 = vpop.eup %3411 }
 0x42d   : > { %v3414_v20 = vpop.eup %3413  ;;  %v1067_v21 = vmul.f32 %v3412_v19, %v1039_v7  ;;  %v1461_v7 = vld [vmem:[%s4348_s10 + $0x28] sm:$0xff]  ;;  %v3160_v19 = vpack.c.bf16 %v1471_v18, %v1470_v17 }
 0x42e   : > { %v3416_v22 = vpop.eup %3415  ;;  %v1068_v23 = vmul.f32 %v3414_v20, %v1040_v8  ;;  %v4146_v8 = vpack.c.bf16 %v1461_v7, %v1460_v6  ;;  %v1546_v20 = vld [vmem:[%s4349_s11] sm:$0x3] }
 0x42f   : > { %v3418_v24 = vpop.eup %3417  ;;  %v1069_v25 = vmul.f32 %v3416_v22, %v1041_v9  ;;  %1076 = vst.msk [vmem:[#allocation2 + $0x1] sm:$0xff] %vm594_vm1, %v1067_v21  ;;  %v1462_v9 = vld [vmem:[%s4348_s10 + $0x30] sm:$0xff]  ;;  %v2542_v21 = vld [vmem:[%s4345_s7] ss:$0 sm:$0xff] }
 0x430   : > { %v1070_v26 = vmul.f32 %v3418_v24, %v1042_v10  ;;  %1077 = vst.msk [vmem:[#allocation2 + $0x9] sm:$0xff] %vm594_vm1, %v1068_v23  ;;  %3146 = vmatpush3.bf16.msra.mxu0 %v4146_v8  ;;  %v1463_v10 = vld [vmem:[%s4348_s10 + $0x38] sm:$0xff]  ;;  %v2543_v23 = vld [vmem:[%s587_s12] ss:$0 sm:$0xff] }
 0x431   : > { %1078 = vst.msk [vmem:[#allocation2 + $0x19] sm:$0xff] %vm594_vm1, %v1069_v25  ;;  %3147 = vmatprep.subr.bf16.mxu0 %v3604_v0  ;;  %v4156_v11 = vpack.c.bf16 %v1463_v10, %v1462_v9 }
 0x432   : > { %1079 = vst.msk [vmem:[#allocation2 + $0x21] sm:$0xff] %vm594_vm1, %v1070_v26 }
 0x434   : > { %3149 = vmatpush3.bf16.msra.mxu0 %v4156_v11 }
 0x435   : > { %3150 = vmatprep.subr.bf16.mxu0 %v3604_v0 }
 0x436   : > { %v1092_v29 = vld [vmem:[#allocation2 + $0x1] sm:$0xff] }
 0x437   : > { %2800 = vmatprep.mubr.msk.f32.mxu1 %vm594_vm1, %v1092_v29  ;;  %v1093_v31 = vld [vmem:[#allocation2 + $0x9] sm:$0xff]  ;;  %v1080_v40 = vld [vmem:[#allocation2] sm:$0xff] }
 0x438   : > { %2801 = vmatmul.mubr.msk.f32.vlgmr.msra.gmra.mrb[2].mxu1 %vm594_vm1, %v1093_v31  ;;  %v1094_v34 = vld [vmem:[#allocation2 + $0x19] sm:$0xff]  ;;  %v1081_v51 = vld [vmem:[#allocation2 + $0x8] sm:$0xff]  ;;  %3152 = vmatpush3.bf16.msra.mxu0 %v4166_v12 }
 0x439   : > { %3109 = vmatpush3.bf16.msra.mxu1 %v4040_v38  ;;  %2803 = vmatprep.mubr.msk.f32.mxu1 %vm594_vm1, %v1094_v34  ;;  %v1095_v36 = vld [vmem:[#allocation2 + $0x21] sm:$0xff]  ;;  %v3118_v38 = vpack.c.bf16 %v1091_v39, %v1090_v37  ;;  %v1082_v54 = vld [vmem:[#allocation2 + $0x18] sm:$0xff]  ;;  %v1300_v3 = vld [vmem:[#allocation2 + $0xa] sm:$0xff] }
 0x43a   : > { %3111 = vmatprep.subr.bf16.mxu1 %v3110_v30  ;;  %v1083_v60 = vld [vmem:[#allocation2 + $0x20] sm:$0xff]  ;;  %3153 = vmatprep.subr.bf16.mxu0 %v3604_v0 }
 0x43b   : > { %v1299_v63 = vld [vmem:[#allocation2 + $0x2] sm:$0xff]  ;;  %v1301_v4 = vld [vmem:[#allocation2 + $0x1a] sm:$0xff] }
 0x43c   : > { %2804 = vmatmul.mubr.msk.f32.gmra.mrb[4].mxu1 %vm594_vm1, %v1095_v36  ;;  %v1302_v5 = vld [vmem:[#allocation2 + $0x22] sm:$0xff]  ;;  %3155 = vmatpush3.bf16.msra.mxu0 %v4176_v14 }
 0x43d   : > { %3113 = vmatpush3.bf16.msra.mxu1 %v3110_v30  ;;  %2822 = vmatprep.mubr.msk.f32.mxu1 %vm594_vm1, %v1080_v40  ;;  %v2544_v30 = vld [vmem:[%s587_s12 + $0x1] ss:$0 sm:$0xff] }
 0x43e   : > { %3115 = vmatprep.subr.bf16.mxu1 %v3114_v35  ;;  %3156 = vmatprep.subr.bf16.mxu0 %v3604_v0 }
 0x440   : > { %3158 = vmatpush3.bf16.msra.mxu0 %v4186_v16 }
 0x441   : > { %3117 = vmatpush3.bf16.msra.mxu1 %v3114_v35  ;;  %3159 = vmatprep.subr.bf16.mxu0 %v3604_v0 }
 0x442   : > { %3119 = vmatprep.subr.bf16.mxu1 %v3118_v38 }
 0x444   : > { %3161 = vmatpush3.bf16.msra.mxu0 %v3160_v19 }
 0x445   : > { %3121 = vmatpush3.bf16.msra.mxu1 %v3118_v38  ;;  %2885 = vmatprep.subr.mxu0 %v3606_v1 }
 0x446   : > { %3123 = vmatprep.subr.bf16.mxu1 %v3122_v46 }
 0x448   : > { %2823 = vmatmul.mubr.msk.f32.vlgmr.msra.gmra.mrb[2].mxu1 %vm594_vm1, %v1081_v51 }
 0x449   : > { %2825 = vmatprep.mubr.msk.f32.mxu1 %vm594_vm1, %v1082_v54  ;;  %3125 = vmatpush3.bf16.msra.mxu1 %v3122_v46 }
 0x44a   : > { %3127 = vmatprep.subr.bf16.mxu1 %v3126_v50 }
 0x44c   : > { %2826 = vmatmul.mubr.msk.f32.gmra.mrb[4].mxu1 %vm594_vm1, %v1083_v60 }
 0x44d   : > { %3129 = vmatpush3.bf16.msra.mxu1 %v3126_v50  ;;  %2844 = vmatprep.mubr.msk.f32.mxu1 %vm594_vm1, %v1299_v63 }
 0x44e   : > { %3131 = vmatprep.subr.bf16.mxu1 %v3130_v59 }
 0x451   : > { %3133 = vmatpush3.bf16.msra.mxu1 %v3130_v59 }
 0x452   : > { %3135 = vmatprep.subr.bf16.mxu1 %v3134_v2 }
 0x455   : > { %3137 = vmatpush3.bf16.msra.mxu1 %v3134_v2 }
 0x456   : > { %2925 = vmatprep.subr.mxu1 %v3606_v1 }
 0x458   : > { %2845 = vmatmul.mubr.msk.f32.vlgmr.msra.gmra.mrb[2].mxu1 %vm594_vm1, %v1300_v3 }
 0x459   : > { %2847 = vmatprep.mubr.msk.f32.mxu1 %vm594_vm1, %v1301_v4  ;;  %2926 = vmatpush3.msk.msra.mxu1 %vm702_vm3, %v1546_v20 }
 0x45c   : > { %2848 = vmatmul.mubr.msk.f32.gmra.mrb[4].mxu1 %vm594_vm1, %v1302_v5 }
 0x45d   : > { %2927 = vmatprep.mubr.msk.f32.mxu1 %vm3605_vm0, %v3606_v1 }
 0x52b   : > { %v2846_v22 = vpop.f32.mrb[2].mxu1 }
 0x52c   : > { %v1421_v24 = vadd.f32 %v2846_v22, %v2542_v21  ;;  %v1390_v25 = vpop.f32.mrb[3].mxu1 }
 0x52d   : > { %v1420_v26 = vadd.f32 %v2542_v21, %v1390_v25 }
 0x52e   : > { %v1439_v27 = vadd.f32 %v2543_v23, %v1421_v24 }
 0x52f   : > { %v1438_v28 = vadd.f32 %v2543_v23, %v1420_v26  ;;  %v2849_v29 = vpop.f32.mrb[4].mxu1  ;;  %v1946_v26 = vld [vmem:[#allocation7 + $0x80] sm:$0xff] }
 0x530   : > { %v1423_v31 = vadd.f32 %v2849_v29, %v2542_v21  ;;  %v1400_v32 = vpop.f32.mrb[5].mxu1  ;;  %v1948_v29 = vld [vmem:[#allocation7 + $0x90] sm:$0xff] }
 0x531   : > { %v1442_v33 = vadd.f32 %v1439_v27, %v1438_v28  ;;  %v1422_v34 = vadd.f32 %v2542_v21, %v1400_v32  ;;  %v1925_v32 = vld [vmem:[#allocation7] sm:$0xff] }
 0x532   : > { %v1441_v35 = vadd.f32 %v2544_v30, %v1423_v31 }
 0x533   : > { %v1443_v36 = vrot.slane %v1442_v33, 4  ;;  %v1440_v37 = vadd.f32 %v2544_v30, %v1422_v34  ;;  %v1949_v30 = vld [vmem:[#allocation7 + $0x98] sm:$0xff] }
 0x534   : > { %v3190_v31 = vpack.c.bf16 %v1949_v30, %v1948_v29  ;;  %v2550_v30 = vld [vmem:[%s4388_s19] ss:$0 sm:$0xff]  ;;  %s4391_s19 = sld [smem:[#allocation22_spill]] }
 0x535   : > { %v1444_v39 = vadd.f32 %v1443_v36, %v1442_v33  ;;  %v1449_v40 = vadd.f32 %v1441_v35, %v1440_v37  ;;  %v1926_v33 = vld [vmem:[#allocation7 + $0x8] sm:$0xff] }
 0x536   : > { %v3218_v34 = vpack.c.bf16 %v1926_v33, %v1925_v32  ;;  %v1951_v36 = vld [vmem:[#allocation7 + $0xa8] sm:$0xff] }
 0x537   : > { %v1445_v38 = vrot.slane %v1444_v39, 2  ;;  %v1450_v41 = vrot.slane %v1449_v40, 4 }
 0x538   : > { %3219 = vmatprep.subr.bf16.mxu1 %v3218_v34 }
 0x539   : > { %v1446_v43 = vadd.f32 %v1445_v38, %v1444_v39  ;;  %v1451_v46 = vadd.f32 %v1450_v41, %v1449_v40  ;;  %v1927_v39 = vld [vmem:[#allocation7 + $0x10] sm:$0xff]  ;;  %v1928_v40 = vld [vmem:[#allocation7 + $0x18] sm:$0xff] }
 0x53a   : > { %v3222_v38 = vpack.c.bf16 %v1928_v40, %v1927_v39  ;;  %v1952_v41 = vld [vmem:[#allocation7 + $0xb0] sm:$0xff]  ;;  %s4294_s0 = scalar_lea.hbm %s4391_s19, %s2567_s16 }
 0x53b   : > { %v1452_v47 = vrot.slane %v1451_v46, 2  ;;  %v1447_v50 = vrot.slane %v1446_v43, 1 }
 0x53d   : > { %v1453_v49 = vadd.f32 %v1452_v47, %v1451_v46  ;;  %v1448_v52 = vadd.f32 %v1447_v50, %v1446_v43  ;;  %v1953_v43 = vld [vmem:[#allocation7 + $0xb8] sm:$0xff]  ;;  %v1929_v47 = vld [vmem:[#allocation7 + $0x20] sm:$0xff] }
 0x53e   : > { %v3198_v46 = vpack.c.bf16 %v1953_v43, %v1952_v41 }
 0x53f   : > { %v1454_v51 = vrot.slane %v1453_v49, 1 }
 0x541   : > { %v1455_v53 = vadd.f32 %v1454_v51, %v1453_v49  ;;  %v1930_v49 = vld [vmem:[#allocation7 + $0x28] sm:$0xff]  ;;  %v1954_v51 = vld [vmem:[#allocation7 + $0xc0] sm:$0xff] }
 0x542   : > { %v3226_v50 = vpack.c.bf16 %v1930_v49, %v1929_v47 }
 0x543   : > { %v1474_v54 = vsel %vm623_vm2, %v1455_v53, %v1448_v52  ;;  %v1955_v52 = vld [vmem:[#allocation7 + $0xc8] sm:$0xff] }
 0x544   : > { %2883 = vmatmul.mubr.f32.vlgmr.msra.gmra.mrb[6].mxu0 %v1474_v54  ;;  %v3202_v53 = vpack.c.bf16 %v1955_v52, %v1954_v51  ;;  %v1931_v54 = vld [vmem:[#allocation7 + $0x30] sm:$0xff] }
 0x545   : > { %2886 = vmatpush3.msk.msra.mxu0 %vm702_vm3, %v1546_v20  ;;  %2887 = vmatprep.mubr.msk.f32.mxu0 %vm3605_vm0, %v3606_v1 }
 0x546   : > { %3162 = vmatprep.subr.bf16.mxu0 %v3604_v0 }
 0x617   : > { %v1542_v59 = vpop.f32.mrb[6].mxu0 }
 0x618   : > { %v2884_v60 = vpop.f32.mrb[7].mxu0  ;;  %2888 = vmatmul.mubr.msk.f32.vlgmr.msra.gmra.mrb[8].mxu0 %vm698_vm4, %v1542_v59  ;;  %v1932_v59 = vld [vmem:[#allocation7 + $0x38] sm:$0xff] }
 0x619   : > { %3164 = vmatpush3.bf16.msra.mxu0 %v4052_v42  ;;  %2922 = vmatprep.mubr.msk.f32.mxu0 %vm3605_vm0, %v3606_v1  ;;  %v3230_v60 = vpack.c.bf16 %v1932_v59, %v1931_v54 }
 0x61a   : > { %3165 = vmatprep.subr.bf16.mxu0 %v3604_v0 }
 0x61d   : > { %3167 = vmatpush3.bf16.msra.mxu0 %v4058_v44 }
 0x61e   : > { %3168 = vmatprep.subr.bf16.mxu0 %v3604_v0 }
 0x621   : > { %3170 = vmatpush3.bf16.msra.mxu0 %v4146_v8 }
 0x622   : > { %3171 = vmatprep.subr.bf16.mxu0 %v3604_v0 }
 0x625   : > { %3173 = vmatpush3.bf16.msra.mxu0 %v4156_v11 }
 0x626   : > { %3174 = vmatprep.subr.bf16.mxu0 %v3604_v0 }
 0x629   : > { %3176 = vmatpush3.bf16.msra.mxu0 %v4166_v12 }
 0x62a   : > { %3177 = vmatprep.subr.bf16.mxu0 %v3604_v0 }
 0x62d   : > { %3179 = vmatpush3.bf16.msra.mxu0 %v4176_v14 }
 0x62e   : > { %3180 = vmatprep.subr.bf16.mxu0 %v3604_v0 }
 0x631   : > { %3182 = vmatpush3.bf16.msra.mxu0 %v4186_v16 }
 0x632   : > { %3183 = vmatprep.subr.bf16.mxu0 %v3604_v0 }
 0x635   : > { %3185 = vmatpush3.bf16.msra.mxu0 %v3160_v19 }
 0x6eb   : > { %v1619_v1 = vpop.f32.mrb[8].mxu0 }
 0x6ec   : > { %v1630_v42 = vrot.slane %v1619_v1, %v3964_v45  ;;  %v2889_v44 = vpop.f32.mrb[9].mxu0  ;;  %v1956_v1 = vld [vmem:[#allocation7 + $0xd0] sm:$0xff] }
 0x6ee   : > { %v1631_v61 = vcombine.high %v1630_v42, %v1630_v42  ;;  %v1638_v62 = vrot.slane %v1630_v42, %v3964_v45  ;;  %v1957_v42 = vld [vmem:[#allocation7 + $0xd8] sm:$0xff] }
 0x6ef   : > { %v3206_v44 = vpack.c.bf16 %v1957_v42, %v1956_v1 }
 0x6f0   : > { %v1645_v63 = vrot.slane %v1631_v61, %v3964_v45  ;;  %v1649_v2 = vrot.slane %v1638_v62, %v3967_v48  ;;  %v1933_v61 = vld [vmem:[#allocation7 + $0x40] sm:$0xff]  ;;  %v1934_v62 = vld [vmem:[#allocation7 + $0x48] sm:$0xff] }
 0x6f2   : > { %v1653_v3 = vrot.slane %v1645_v63, %v3967_v48  ;;  %v4235_v4 = vsub.f32 %v1438_v28, %v1649_v2  ;;  %v4237_v5 = vsub.f32 %v1439_v27, %v1649_v2  ;;  %v1947_v27 = vld [vmem:[#allocation7 + $0x88] sm:$0xff]  ;;  %v3234_v63 = vpack.c.bf16 %v1934_v62, %v1933_v61  ;;  %v1958_v2 = vld [vmem:[#allocation7 + $0xe0] sm:$0xff]  ;;  %v2140_v61 = vld [vmem:[#allocation7 + $0x118] sm:$0xff] }
 0x6f3   : > { %v3186_v28 = vpack.c.bf16 %v1947_v27, %v1946_v26  ;;  %v2549_v26 = vld [vmem:[%s4387_s15] ss:$0 sm:$0xff] }
 0x6f4   : > { %v4239_v6 = vsub.f32 %v1440_v37, %v1653_v3  ;;  %v4241_v0 = vsub.f32 %v1441_v35, %v1653_v3  ;;  %v1660_v7 = vmul.f32 %v4235_v4, %v4235_v4  ;;  %v1661_v8 = vmul.f32 %v4237_v5, %v4237_v5  ;;  %v1950_v35 = vld [vmem:[#allocation7 + $0xa0] sm:$0xff]  ;;  %v1959_v3 = vld [vmem:[#allocation7 + $0xe8] sm:$0xff] }
 0x6f5   : > { %3187 = vmatprep.subr.bf16.mxu0 %v3186_v28  ;;  %v3194_v37 = vpack.c.bf16 %v1951_v36, %v1950_v35 }
 0x6f6   : > { %v1662_v9 = vmul.f32 %v4239_v6, %v4239_v6  ;;  %v1663_v10 = vmul.f32 %v4241_v0, %v4241_v0  ;;  %v1664_v11 = vadd.f32 %v1661_v8, %v1660_v7  ;;  %v3210_v7 = vpack.c.bf16 %v1959_v3, %v1958_v2  ;;  %v1935_v8 = vld [vmem:[#allocation7 + $0x50] sm:$0xff]  ;;  %v2141_v3 = vld [vmem:[#allocation7 + $0x120] sm:$0xff] }
 0x6f8   : > { %v1665_v55 = vrot.slane %v1664_v11, 4  ;;  %v1671_v56 = vadd.f32 %v1663_v10, %v1662_v9  ;;  %v1936_v9 = vld [vmem:[#allocation7 + $0x58] sm:$0xff] }
 0x6f9   : > { %v3238_v10 = vpack.c.bf16 %v1936_v9, %v1935_v8 }
 0x6fa   : > { %v1666_v12 = vadd.f32 %v1665_v55, %v1664_v11  ;;  %v1672_v13 = vrot.slane %v1671_v56, 4  ;;  %v1960_v11 = vld [vmem:[#allocation7 + $0xf0] sm:$0xff]  ;;  %v1961_v55 = vld [vmem:[#allocation7 + $0xf8] sm:$0xff] }
 0x6fc   : > { %v1667_v57 = vrot.slane %v1666_v12, 2  ;;  %v1673_v14 = vadd.f32 %v1672_v13, %v1671_v56  ;;  %v3214_v56 = vpack.c.bf16 %v1961_v55, %v1960_v11  ;;  %v1938_v13 = vld [vmem:[#allocation7 + $0x68] sm:$0xff]  ;;  %v2143_v11 = vld [vmem:[#allocation7 + $0x130] sm:$0xff]  ;;  %v2144_v55 = vld [vmem:[#allocation7 + $0x138] sm:$0xff] }
 0x6fe   : > { %v1668_v58 = vadd.f32 %v1667_v57, %v1666_v12  ;;  %v1674_v15 = vrot.slane %v1673_v14, 2  ;;  %v1937_v12 = vld [vmem:[#allocation7 + $0x60] sm:$0xff] }
 0x6ff   : > { %v3242_v57 = vpack.c.bf16 %v1938_v13, %v1937_v12  ;;  %v3262_v12 = vpack.c.bf16 %v2144_v55, %v2143_v11  ;;  %v2145_v13 = vld [vmem:[#allocation7 + $0x140] sm:$0xff] }
 0x700   : > { %v1669_v16 = vrot.slane %v1668_v58, 1  ;;  %v1675_v17 = vadd.f32 %v1674_v15, %v1673_v14  ;;  %v1939_v14 = vld [vmem:[#allocation7 + $0x70] sm:$0xff] }
 0x702   : > { %v1676_v18 = vrot.slane %v1675_v17, 1  ;;  %v1670_v19 = vadd.f32 %v1669_v16, %v1668_v58  ;;  %v1940_v58 = vld [vmem:[#allocation7 + $0x78] sm:$0xff]  ;;  %v2137_v16 = vld [vmem:[#allocation7 + $0x100] sm:$0xff] }
 0x703   : > { %v3246_v15 = vpack.c.bf16 %v1940_v58, %v1939_v14  ;;  %v2147_v58 = vld [vmem:[#allocation7 + $0x150] sm:$0xff] }
 0x704   : > { %v1677_v20 = vadd.f32 %v1676_v18, %v1675_v17  ;;  %v2138_v17 = vld [vmem:[#allocation7 + $0x108] sm:$0xff] }
 0x705   : > { %v4253_v18 = vpack.c.bf16 %v2138_v17, %v2137_v16  ;;  %v2149_v17 = vld [vmem:[#allocation7 + $0x160] sm:$0xff] }
 0x706   : > { %v1680_v21 = vsel %vm623_vm2, %v1677_v20, %v1670_v19 }
 0x707   : > { %2923 = vmatmul.mubr.f32.vlgmr.msra.gmra.mrb[10].mxu0 %v1680_v21 }
 0x708   : > { %3189 = vmatpush3.bf16.msra.mxu0 %v3186_v28 }
 0x709   : > { %3191 = vmatprep.subr.bf16.mxu0 %v3190_v31 }
 0x70c   : > { %3193 = vmatpush3.bf16.msra.mxu0 %v3190_v31 }
 0x70d   : > { %3195 = vmatprep.subr.bf16.mxu0 %v3194_v37 }
 0x710   : > { %3197 = vmatpush3.bf16.msra.mxu0 %v3194_v37 }
 0x711   : > { %3199 = vmatprep.subr.bf16.mxu0 %v3198_v46 }
 0x714   : > { %3201 = vmatpush3.bf16.msra.mxu0 %v3198_v46 }
 0x715   : > { %3203 = vmatprep.subr.bf16.mxu0 %v3202_v53 }
 0x718   : > { %3205 = vmatpush3.bf16.msra.mxu0 %v3202_v53 }
 0x719   : > { %3207 = vmatprep.subr.bf16.mxu0 %v3206_v44 }
 0x71c   : > { %3209 = vmatpush3.bf16.msra.mxu0 %v3206_v44  ;;  %v2139_v44 = vld [vmem:[#allocation7 + $0x110] sm:$0xff] }
 0x71d   : > { %3211 = vmatprep.subr.bf16.mxu0 %v3210_v7 }
 0x720   : > { %3213 = vmatpush3.bf16.msra.mxu0 %v3210_v7  ;;  %v2142_v7 = vld [vmem:[#allocation7 + $0x128] sm:$0xff] }
 0x721   : > { %3215 = vmatprep.subr.bf16.mxu0 %v3214_v56  ;;  %v3258_v9 = vpack.c.bf16 %v2142_v7, %v2141_v3 }
 0x724   : > { %3217 = vmatpush3.bf16.msra.mxu0 %v3214_v56 }
 0x7da   : > { %v1748_v22 = vpop.f32.mrb[10].mxu0 }
 0x7db   : > { %v1749_v23 = vadd.f32 1e-05, %v1748_v22  ;;  %v2924_v24 = vpop.f32.mrb[11].mxu0 }
 0x7dd   : > { %3419 = vrsqrt.f32 %v1749_v23 }
 0x7e7   : > { %v3420_v25 = vpop.eup %3419 }
 0x7e8   : > { %2928 = vmatmul.mubr.msk.f32.vlgmr.msra.gmra.mrb[6].mxu1 %vm698_vm4, %v3420_v25 }
 0x7e9   : > { %3221 = vmatpush3.bf16.msra.mxu1 %v3218_v34 }
 0x7ea   : > { %3223 = vmatprep.subr.bf16.mxu1 %v3222_v38 }
 0x7ed   : > { %3225 = vmatpush3.bf16.msra.mxu1 %v3222_v38 }
 0x7ee   : > { %3227 = vmatprep.subr.bf16.mxu1 %v3226_v50 }
 0x7f1   : > { %3229 = vmatpush3.bf16.msra.mxu1 %v3226_v50 }
 0x7f2   : > { %3231 = vmatprep.subr.bf16.mxu1 %v3230_v60 }
 0x7f5   : > { %3233 = vmatpush3.bf16.msra.mxu1 %v3230_v60 }
 0x7f6   : > { %3235 = vmatprep.subr.bf16.mxu1 %v3234_v63 }
 0x7f9   : > { %3237 = vmatpush3.bf16.msra.mxu1 %v3234_v63  ;;  %v3254_v63 = vpack.c.bf16 %v2140_v61, %v2139_v44 }
 0x7fa   : > { %3239 = vmatprep.subr.bf16.mxu1 %v3238_v10 }
 0x7fd   : > { %3241 = vmatpush3.bf16.msra.mxu1 %v3238_v10 }
 0x7fe   : > { %3243 = vmatprep.subr.bf16.mxu1 %v3242_v57 }
 0x801   : > { %3245 = vmatpush3.bf16.msra.mxu1 %v3242_v57  ;;  %v2146_v57 = vld [vmem:[#allocation7 + $0x148] sm:$0xff] }
 0x802   : > { %3247 = vmatprep.subr.bf16.mxu1 %v3246_v15  ;;  %v3266_v14 = vpack.c.bf16 %v2146_v57, %v2145_v13 }
 0x805   : > { %3249 = vmatpush3.bf16.msra.mxu1 %v3246_v15  ;;  %v2148_v15 = vld [vmem:[#allocation7 + $0x158] sm:$0xff] }
 0x806   : > { %3251 = vmatprep.subr.bf16.mxu1 %v4253_v18  ;;  %v3270_v16 = vpack.c.bf16 %v2148_v15, %v2147_v58 }
 0x8bb   : > { %v1822_v19 = vpop.f32.mrb[6].mxu1 }
 0x8bc   : > { %v1833_v20 = vrot.slane %v1822_v19, %v3964_v45  ;;  %v2929_v21 = vpop.f32.mrb[7].mxu1 }
 0x8bd   : > { %v2152_v21 = vld [vmem:[#allocation7 + $0x178] sm:$0xff] }
 0x8be   : > { %v1834_v22 = vcombine.high %v1833_v20, %v1833_v20  ;;  %v1841_v23 = vrot.slane %v1833_v20, %v3964_v45  ;;  %v2151_v20 = vld [vmem:[#allocation7 + $0x170] sm:$0xff] }
 0x8c0   : > { %v1848_v24 = vrot.slane %v1834_v22, %v3964_v45  ;;  %v1852_v25 = vrot.slane %v1841_v23, %v3967_v48  ;;  %v3278_v22 = vpack.c.bf16 %v2152_v21, %v2151_v20  ;;  %v2253_v23 = vld [vmem:[#allocation9] sm:$0xff] }
 0x8c2   : > { %v1856_v27 = vrot.slane %v1848_v24, %v3967_v48  ;;  %v1859_v28 = vmul.f32 %v1852_v25, %v4235_v4  ;;  %v1860_v29 = vmul.f32 %v1852_v25, %v4237_v5  ;;  %v2254_v24 = vld [vmem:[#allocation9 + $0x8] sm:$0xff] }
 0x8c3   : > { %v3282_v25 = vpack.c.bf16 %v2254_v24, %v2253_v23 }
 0x8c4   : > { %v1861_v31 = vmul.f32 %v1856_v27, %v4239_v6  ;;  %v1862_v45 = vmul.f32 %v1856_v27, %v4241_v0  ;;  %v1870_v32 = vmul.f32 %v2549_v26, %v1859_v28  ;;  %v1871_v33 = vmul.f32 %v2549_v26, %v1860_v29  ;;  %v2256_v27 = vld [vmem:[#allocation9 + $0x18] sm:$0xff] }
 0x8c6   : > { %v1872_v34 = vmul.f32 %v2549_v26, %v1861_v31  ;;  %v1873_v35 = vmul.f32 %v2549_v26, %v1862_v45  ;;  %v1881_v36 = vadd.f32 %v2550_v30, %v1870_v32  ;;  %v1882_v37 = vadd.f32 %v2550_v30, %v1871_v33  ;;  %v2255_v26 = vld [vmem:[#allocation9 + $0x10] sm:$0xff]  ;;  %v2258_v31 = vld [vmem:[#allocation9 + $0x28] sm:$0xff] }
 0x8c7   : > { %v3286_v28 = vpack.c.bf16 %v2256_v27, %v2255_v26 }
 0x8c8   : > { %v1883_v39 = vadd.f32 %v2550_v30, %v1872_v34  ;;  %v1884_v48 = vadd.f32 %v2550_v30, %v1873_v35  ;;  %v2551_v40 = vmul.f32 -1.442695, %v1881_v36  ;;  %v2552_v4 = vmul.f32 -1.442695, %v1882_v37  ;;  %v2257_v30 = vld [vmem:[#allocation9 + $0x20] sm:$0xff]  ;;  %v2259_v34 = vld [vmem:[#allocation9 + $0x30] sm:$0xff] }
 0x8c9   : > { %v3290_v32 = vpack.c.bf16 %v2258_v31, %v2257_v30  ;;  %v2260_v35 = vld [vmem:[#allocation9 + $0x38] sm:$0xff] }
 0x8ca   : > { %3421 = vpow2.f32 %v2551_v40  ;;  %v2553_v5 = vmul.f32 -1.442695, %v1883_v39  ;;  %v2554_v38 = vmul.f32 -1.442695, %v1884_v48  ;;  %v3440_v40 = vld [vmem:[%s3883_s17 + $0x18] sm:$0xff] }
 0x8cb   : > { %3423 = vpow2.f32 %v2552_v4 }
 0x8cc   : > { %3425 = vpow2.f32 %v2553_v5 }
 0x8cd   : > { %3427 = vpow2.f32 %v2554_v38 }
 0x8d4   : > { %v3422_v41 = vpop.eup %3421 }
 0x8d5   : > { %v3424_v6 = vpop.eup %3423  ;;  %v1897_v43 = vadd.f32 1.0, %v3422_v41 }
 0x8d6   : > { %v3426_v0 = vpop.eup %3425  ;;  %v1898_v46 = vadd.f32 1.0, %v3424_v6  ;;  %v2555_v6 = vld [vmem:[%s4389_s18] ss:$0 sm:$0xff]  ;;  %s3608_s18 = smov [#allocation10]  }
 0x8d7   : > { %v3428_v47 = vpop.eup %3427  ;;  %v1899_v49 = vadd.f32 1.0, %v3426_v0  ;;  %3429 = vrcp.f32 %v1897_v43  ;;  %s3531_s30 = sshll.u32 %s3608_s18, 4  ;;  %s3532_s30 = int_to_ptr.vmem [resolvable:$false] %s3531_s30 }
 0x8d8   : > { %v1900_v50 = vadd.f32 1.0, %v3428_v47  ;;  %3431 = vrcp.f32 %v1898_v46  ;;  %s3533_s27 = scalar_lea.vmem %s3532_s30, 1024 }
 0x8d9   : > { %3433 = vrcp.f32 %v1899_v49 }
 0x8da   : > { %3435 = vrcp.f32 %v1900_v50  ;;  %v2556_v50 = vld [vmem:[%s4390_s29] ss:$0 sm:$0xff] }
 0x8e1   : > { %v3430_v51 = vpop.eup %3429 }
 0x8e2   : > { %v3432_v52 = vpop.eup %3431  ;;  %v1909_v53 = vmul.f32 %v3430_v51, %v1881_v36  ;;  %v3437_v36 = vld [vmem:[%s3883_s17] sm:$0xff] }
 0x8e3   : > { %v3434_v54 = vpop.eup %3433  ;;  %v1910_v59 = vmul.f32 %v3432_v52, %v1882_v37  ;;  %v3294_v37 = vpack.c.bf16 %v2260_v35, %v2259_v34 }
 0x8e4   : > { %v3436_v60 = vpop.eup %3435  ;;  %v1911_v1 = vmul.f32 %v3434_v54, %v1883_v39  ;;  %1917 = vst [vmem:[#allocation3 + $0x1] sm:$0xff] %v1909_v53  ;;  %2962 = vmatprep.mubr.f32.mxu0 %v1909_v53  ;;  %v3438_v39 = vld [vmem:[%s3883_s17 + $0x8] sm:$0xff] }
 0x8e5   : > { %v1912_v42 = vmul.f32 %v3436_v60, %v1884_v48  ;;  %1918 = vst [vmem:[#allocation3 + $0x9] sm:$0xff] %v1910_v59  ;;  %2963 = vmatmul.mubr.f32.vlgmr.msra.gmra.mrb[12].mxu0 %v1910_v59  ;;  %v3439_v48 = vld [vmem:[%s3883_s17 + $0x10] sm:$0xff]  ;;  %s582_s17 = scalar_lea.vmem [#allocation10], %s2497_s26 }
 0x8e6   : > { %1919 = vst [vmem:[#allocation3 + $0x19] sm:$0xff] %v1911_v1  ;;  %2965 = vmatprep.mubr.f32.mxu0 %v1911_v1  ;;  %s2387_s15 = sshll.u32 %s582_s17, 4  ;;  %s4289_s15 = int_to_ptr.vmem [resolvable:$true] %s2387_s15 }
 0x8e7   : > { %1920 = vst [vmem:[#allocation3 + $0x21] sm:$0xff] %v1912_v42  ;;  %s3527_s12 = scalar_lea.vmem %s4289_s15, 512  ;;  %p3534_p9 = scmp.lt.s32.totalorder %s4289_s15, %s3532_s30 }
 0x8e8   : > { %p3528_p0 = scmp.ne.s32.totalorder %s4289_s15, %s3527_s12  ;;  %p3535_p12 = scmp.lt.s32.totalorder %s3533_s27, %s3527_s12 }
 0x8e9   : > { %2966 = vmatmul.mubr.f32.gmra.mrb[14].mxu0 %v1912_v42 }
 0x8ea   : > { %p3529_p3 = pnand %p3528_p0, %p4392_p2  ;;  %p3536_p1 = por %p3535_p12, %p3534_p9 }
 0x8eb   : > { %v1921_v62 = vld [vmem:[#allocation3] sm:$0xff] }
 0x8ec   : > { %3000 = vmatprep.mubr.f32.mxu1 %v1921_v62  ;;  %v1922_v2 = vld [vmem:[#allocation3 + $0x8] sm:$0xff]  ;;  %p3530_p7 = pneg %p3529_p3 }
 0x8ed   : > { %3001 = vmatmul.mubr.f32.vlgmr.msra.gmra.mrb[8].mxu1 %v1922_v2  ;;  %v1923_v8 = vld [vmem:[#allocation3 + $0x18] sm:$0xff]  ;;  %v2132_v56 = vld [vmem:[#allocation3 + $0x2] sm:$0xff]  ;;  %v2133_v29 = vld [vmem:[#allocation3 + $0xa] sm:$0xff] }
 0x8ee   : > { %3253 = vmatpush3.bf16.msra.mxu1 %v4253_v18  ;;  %3003 = vmatprep.mubr.f32.mxu1 %v1923_v8  ;;  %v1924_v10 = vld [vmem:[#allocation3 + $0x20] sm:$0xff]  ;;  %v2150_v18 = vld [vmem:[#allocation7 + $0x168] sm:$0xff]  ;;  %p3537_p13 = pnand %p3536_p1, %p3530_p7 }
 0x8ef   : > { %3255 = vmatprep.subr.bf16.mxu1 %v3254_v63  ;;  %v3274_v19 = vpack.c.bf16 %v2150_v18, %v2149_v17  ;;  %v2134_v45 = vld [vmem:[#allocation3 + $0x1a] sm:$0xff]  ;;  %v2135_v33 = vld [vmem:[#allocation3 + $0x22] sm:$0xff] }
 0x8f1   : > { %3004 = vmatmul.mubr.f32.gmra.mrb[10].mxu1 %v1924_v10 }
 0x8f2   : > { %3257 = vmatpush3.bf16.msra.mxu1 %v3254_v63  ;;  %3038 = vmatprep.mubr.f32.mxu1 %v2132_v56 }
 0x8f3   : > { %3259 = vmatprep.subr.bf16.mxu1 %v3258_v9 }
 0x8f6   : > { %3261 = vmatpush3.bf16.msra.mxu1 %v3258_v9 }
 0x8f7   : > { %3263 = vmatprep.subr.bf16.mxu1 %v3262_v12 }
 0x8fa   : > { %3265 = vmatpush3.bf16.msra.mxu1 %v3262_v12 }
 0x8fb   : > { %3267 = vmatprep.subr.bf16.mxu1 %v3266_v14 }
 0x8fe   : > { %3269 = vmatpush3.bf16.msra.mxu1 %v3266_v14 }
 0x8ff   : > { %3271 = vmatprep.subr.bf16.mxu1 %v3270_v16 }
 0x902   : > { %3273 = vmatpush3.bf16.msra.mxu1 %v3270_v16 }
 0x903   : > { %3275 = vmatprep.subr.bf16.mxu1 %v3274_v19 }
 0x906   : > { %3277 = vmatpush3.bf16.msra.mxu1 %v3274_v19 }
 0x907   : > { %3279 = vmatprep.subr.bf16.mxu1 %v3278_v22 }
 0x90a   : > { %3281 = vmatpush3.bf16.msra.mxu1 %v3278_v22 }
 0x90b   : > { %3283 = vmatprep.subr.bf16.mxu1 %v3282_v25 }
 0x90d   : > { %3039 = vmatmul.mubr.f32.vlgmr.msra.gmra.mrb[8].mxu1 %v2133_v29 }
 0x90e   : > { %3041 = vmatprep.mubr.f32.mxu1 %v2134_v45  ;;  %3285 = vmatpush3.bf16.msra.mxu1 %v3282_v25 }
 0x90f   : > { %3287 = vmatprep.subr.bf16.mxu1 %v3286_v28 }
 0x911   : > { %3042 = vmatmul.mubr.f32.gmra.mrb[10].mxu1 %v2135_v33 }
 0x912   : > { %3289 = vmatpush3.bf16.msra.mxu1 %v3286_v28  ;;  %3060 = vmatprep.mubr.msk.f32.mxu1 %vm594_vm1, %v3437_v36 }
 0x913   : > { %3291 = vmatprep.subr.bf16.mxu1 %v3290_v32 }
 0x916   : > { %3293 = vmatpush3.bf16.msra.mxu1 %v3290_v32 }
 0x917   : > { %3295 = vmatprep.subr.bf16.mxu1 %v3294_v37 }
 0x91a   : > { %3297 = vmatpush3.bf16.msra.mxu1 %v3294_v37 }
 0x91d   : > { %3061 = vmatmul.mubr.msk.f32.vlgmr.msra.gmra.mrb[8].mxu1 %vm594_vm1, %v3438_v39 }
 0x91e   : > { %3063 = vmatprep.mubr.msk.f32.mxu1 %vm594_vm1, %v3439_v48 }
 0x921   : > { %3064 = vmatmul.mubr.msk.f32.gmra.mrb[10].mxu1 %vm594_vm1, %v3440_v40 }
 0x9b8   : > { %v2964_v4 = vpop.f32.mrb[12].mxu0 }
 0x9b9   : > { %v2028_v5 = vpop.f32.mrb[13].mxu0  ;;  %v3298_v43 = vadd.f32 %v2964_v4, %v2555_v6 }
 0x9ba   : > { %v3301_v46 = vadd.f32 %v2555_v6, %v2028_v5 }
 0x9bc   : > { %v2967_v38 = vpop.f32.mrb[14].mxu0 }
 0x9bd   : > { %v2038_v41 = vpop.f32.mrb[15].mxu0  ;;  %v3304_v0 = vadd.f32 %v2967_v38, %v2555_v6 }
 0x9be   : > { %v3307_v47 = vadd.f32 %v2555_v6, %v2038_v41 }
 0x9bf   : > { %v3305_v59 = vadd.f32 %v3304_v0, %v2556_v50 }
 0x9c0   : > { %v3308_v42 = vadd.f32 %v3307_v47, %v2556_v50 }
 0x9f0   : > { %v3062_v49 = vpop.f32.mrb[8].mxu1 }
 0x9f1   : > { %v3299_v51 = vadd.f32 %v3298_v43, %v3062_v49  ;;  %v2346_v52 = vpop.f32.mrb[9].mxu1 }
 0x9f2   : > { %v3302_v53 = vadd.f32 %v3301_v46, %v2346_v52 }
 0x9f3   : > { %v3300_v54 = vadd.f32 %v3299_v51, %v2556_v50 }
 0x9f4   : > { %v3303_v60 = vadd.f32 %v3302_v53, %v2556_v50  ;;  %v3065_v1 = vpop.f32.mrb[10].mxu1 }
 0x9f5   : > { %2370 = vst [vmem:[%s582_s17 + $0x8] sm:$0xff] %v3300_v54  ;;  %v3306_v44 = vadd.f32 %v3305_v59, %v3065_v1  ;;  %v2356_v61 = vpop.f32.mrb[11].mxu1 }
 0x9f6   : > { %2369 = vst [vmem:[%s582_s17] sm:$0xff] %v3303_v60  ;;  %v3309_v62 = vadd.f32 %v3308_v42, %v2356_v61 }
 0x9f7   : > { %2372 = vst [vmem:[%s582_s17 + $0x18] sm:$0xff] %v3306_v44 }
 0x9f8   : > { %2371 = vst [vmem:[%s582_s17 + $0x10] sm:$0xff] %v3309_v62 }
 0x9f9   : > { %3540 = shalt.err (!%p3537_p13)
}
 0x9fa   : > { %s3541_s29 = scalar_lea.hbm %s4294_s0, 512  ;;  %s3545_s26 = scalar_lea.hbm %s4391_s19, 1024 }
 0x9fb   : > { %p3542_p6 = scmp.ne.s32.totalorder %s4294_s0, %s3541_s29  ;;  %p3546_p5 = scmp.lt.u32.totalorder %s4294_s0, %s4391_s19 }
 0x9fc   : > { %p3547_p8 = scmp.lt.u32.totalorder %s3545_s26, %s3541_s29  ;;  %p3549_p0 = scmp.lt.u32.totalorder %s3541_s29, %s4294_s0 }
 0x9fd   : > { %p3543_p10 = pnand %p3542_p6, %p4392_p2 }
 0x9fe   : > { %p3548_p11 = por %p3547_p8, %p3546_p5 }
 0x9ff   : > { %p3544_p4 = pneg %p3543_p10 }
 0xa00   : > { %p3550_p3 = por %p3549_p0, %p3548_p11 }
 0xa02   : > { %p3551_p7 = pnand %p3550_p3, %p3544_p4 }
 0xa04   : > { %3554 = shalt.err (!%p3551_p7)
}
 0xa05   : > { %s3609_s12 = smov 128   ;;  %s3610_s30 = smov 8  }
 0xa06   : > { %3336 = dma.vmem_to_hbm [thread:$0]  (%p4392_p2), %s4289_s15, 512, %s4294_s0, %s2374_s25, %s3609_s12, %s3609_s12, %s3610_s30  }
 0xa07 PF: > { %s4393_s27 = sld [smem:[#allocation14_spill]]  ;;  %s4394_s17 = sld [smem:[#allocation15_spill]] }
 0xa08   : > { %p4396_p12 = scmp.ge.s32.totalorder %s3597_s24, 2 }
 0xa0d   : > { %s2402_s16 = sand.u32 1, %s4393_s27   ;;  %p4395_p9 = scmp.ne.s32.totalorder %s4394_s17, 0 }
 0xa0e   : > { %s2403_s29 = scalar_lea.sflag [#allocation6], %s2402_s16 }
 0xa0f   : > { %p3350_p1 = pnand %p4396_p12, %p4395_p9 }
 0xa11   : > { %3580 = dma.done.wait (!%p3350_p1), %s2403_s29, 512  }
 0xa12   : > { %3582 = vsyncadd (!%p3350_p1), %s2403_s29, 4294966784  ;;  %p30_p13 = scmp.ge.s32.totalorder %s3812_s13, 4   ;;  %s4397_s21 = smov %s3589_s22 }
 0xa13   : > { %s4398_s22 = smov %s3593_s23  ;;  %s4399_s23 = smov %s3828_s20 }
 0xa14   : > { %s4400_s24 = smov %s3812_s13  ;;  %32 = sbr.rel (!%p30_p13) target bundleno = 14 (0xe), region = 144 }
 0xa1b   :  { %2408 = vsyncpa [#allocation5], 1 }
 0xa1c   :  { %2410 = vsyncpa [#allocation5 + $0x1], 1 }
 0xa1d   :  { %2411 = vsyncpa [#allocation8], 1 }
 0xa1e   :  { %2412 = vsyncpa [#allocation6], 1 }
 0xa1f   :  { %2414 = vsyncpa [#allocation6 + $0x1], 1 }

</bundles_post_ra>
